<compile_context>
chip_gen: v6e
topology: v6e:2x2x1
jax: 0.10.0
libtpu: 0.0.40
codegen_flags: <defaults>
</compile_context>

<pallas_src>
import math

import jax
import jax.numpy as jnp
from jax.experimental import pallas as pl
from jax.experimental.pallas import tpu as pltpu

# ----------------------------- tiny BERT config -----------------------------
HIDDEN = 32
NUM_HEADS = 2
HEAD_DIM = HIDDEN // NUM_HEADS
INTERMEDIATE = 64
NUM_LAYERS = 2
VOCAB = 100
MAX_POS = 16
TYPE_VOCAB = 2
NUM_LABELS = 3
BATCH = 2
SEQ = 8
LN_EPS = 1e-12
ATTN_SCALE = 1.0 / math.sqrt(HEAD_DIM)

# Static column offsets inside the per-layer weight slab: [qkv_w | o_w | ff1_w]
_QKV_OFF = 0
_O_OFF = 3 * HIDDEN
_FF1_OFF = 4 * HIDDEN
_LAYER_W_COLS = 4 * HIDDEN + INTERMEDIATE       # 192
_LAYER_V_COLS = 3 * HIDDEN                      # 96  (widest per-layer vector = qkv_b)


# --------------------------- in-kernel helper math ---------------------------
def _layernorm(x, g, b):
    mu = jnp.mean(x, axis=-1, keepdims=True)
    xc = x - mu
    var = jnp.mean(xc * xc, axis=-1, keepdims=True)
    return xc * jax.lax.rsqrt(var + LN_EPS) * g + b


def _gelu(y):
    # TODO(synk): HF BERT default is exact erf-GELU; tanh approximation used here.
    c = math.sqrt(2.0 / math.pi)
    return 0.5 * y * (1.0 + jnp.tanh(c * (y + 0.044715 * y * y * y)))


# ------------------------------- fused kernel --------------------------------
def fused_bert_kernel(x_ref, bias_ref, onehot_ref,
                      layer_w_ref, layer_w2_ref, layer_v_ref,
                      head_w_ref, head_v_ref,
                      logits_ref, loss_ref):
    """Entire BERT forward (post-embedding) in one kernel; everything VMEM-resident."""
    B, S, H, I, Dh, NH = BATCH, SEQ, HIDDEN, INTERMEDIATE, HEAD_DIM, NUM_HEADS
    # q @ k^T via contraction on the last dim of both operands (no materialized transpose)
    contract_last = (((1,), (1,)), ((), ()))

    hv = head_v_ref[...]                                  # (4, H): emb_g, emb_b, pooler_b, cls_b
    x = _layernorm(x_ref[...], hv[0:1, :], hv[1:2, :])    # (B*S, H)
    attn_bias = bias_ref[...]                             # (B*S, B*S) block-diag additive mask

    for l in range(NUM_LAYERS):
        w = layer_w_ref[l]                                # (H, 4H + I)   [qkv | o | ff1]
        w2 = layer_w2_ref[l]                              # (I, H)        ff2
        v = layer_v_ref[l]                                # (8, 3H)       per-layer vectors

        qkv_w = w[:, _QKV_OFF:_QKV_OFF + 3 * H]           # Q cols pre-scaled by 1/sqrt(Dh)
        o_w = w[:, _O_OFF:_O_OFF + H]
        ff1_w = w[:, _FF1_OFF:_FF1_OFF + I]

        qkv_b = v[0:1, :]                                 # (1, 3H)
        o_b = v[1:2, :H]
        ln1_g = v[2:3, :H]
        ln1_b = v[3:4, :H]
        ff1_b = v[4:5, :I]
        ff2_b = v[5:6, :H]
        ln2_g = v[6:7, :H]
        ln2_b = v[7:8, :H]

        # fused QKV projection: one MXU push with N = 3*H
        qkv = jnp.dot(x, qkv_w, preferred_element_type=jnp.float32) + qkv_b   # (B*S, 3H)

        # attention over the flattened token grid; batch separation comes from attn_bias
        ctx_heads = []
        for h in range(NH):
            q_h = qkv[:, h * Dh:(h + 1) * Dh]                          # (B*S, Dh), scale folded in
            k_h = qkv[:, H + h * Dh:H + (h + 1) * Dh]                  # (B*S, Dh)
            v_h = qkv[:, 2 * H + h * Dh:2 * H + (h + 1) * Dh]          # (B*S, Dh)

            s = jax.lax.dot_general(q_h, k_h, contract_last,
                                    preferred_element_type=jnp.float32)       # (B*S, B*S)
            s = s + attn_bias
            s = s - jnp.max(s, axis=-1, keepdims=True)
            e = jnp.exp(s)
            prob = e * pl.reciprocal(jnp.sum(e, axis=-1, keepdims=True), approx=True)
            ctx_heads.append(jnp.dot(prob, v_h, preferred_element_type=jnp.float32))

        ctx = jnp.concatenate(ctx_heads, axis=-1)                               # (B*S, H)
        attn_out = jnp.dot(ctx, o_w, preferred_element_type=jnp.float32) + o_b  # one o_w matmul

        # fused residual + LayerNorm
        x = _layernorm(x + attn_out, ln1_g, ln1_b)

        ff = _gelu(jnp.dot(x, ff1_w, preferred_element_type=jnp.float32) + ff1_b)
        ff = jnp.dot(ff, w2, preferred_element_type=jnp.float32) + ff2_b
        x = _layernorm(x + ff, ln2_g, ln2_b)

    # pooler on the [CLS] token of each example (row 0 of each (S, H) block)
    cls_tok = x.reshape(B, S, H)[:, 0, :]                                       # (B, H)
    pooler_w = head_w_ref[:, :H]
    cls_w = head_w_ref[:, H:H + NUM_LABELS]
    pooled = jnp.tanh(jnp.dot(cls_tok, pooler_w,
                              preferred_element_type=jnp.float32) + hv[2:3, :])
    # TODO(synk): train-mode dropout (p=0.3) omitted; forward matches model.eval().
    logits = jnp.dot(pooled, cls_w,
                     preferred_element_type=jnp.float32) + hv[3:4, :NUM_LABELS]
    logits_ref[...] = logits

    # mean cross-entropy (reduction='mean')
    mmax = jnp.max(logits, axis=-1, keepdims=True)
    lse = jnp.log(jnp.sum(jnp.exp(logits - mmax), axis=-1, keepdims=True)) + mmax
    true_logit = jnp.sum(logits * onehot_ref[...], axis=-1, keepdims=True)
    per_ex = lse - true_logit                                                   # (B, 1)
    loss_ref[...] = jnp.sum(per_ex, axis=0, keepdims=True) * (1.0 / B)


# ---------------------------- host-side param packing ------------------------
def pack_params(p):
    """Pack all weights/biases into 5 contiguous slabs (few DMAs, static in-kernel slices)."""
    H, I = HIDDEN, INTERMEDIATE

    def row(vec, width):
        v = vec.reshape(1, -1)
        return jnp.pad(v, ((0, 0), (0, width - v.shape[1])))

    # fold 1/sqrt(Dh) into the Q columns of the fused QKV weight & bias
    q_scale = jnp.concatenate([jnp.full((H,), ATTN_SCALE, jnp.float32),
                               jnp.ones((2 * H,), jnp.float32)]).reshape(1, 3 * H)

    layer_w, layer_w2, layer_v = [], [], []
    for lp in p["layers"]:
        qkv_w = lp["qkv_w"] * q_scale
        qkv_b = lp["qkv_b"] * q_scale
        layer_w.append(jnp.concatenate([qkv_w, lp["o_w"], lp["ff1_w"]], axis=1))   # (H, 192)
        layer_w2.append(lp["ff2_w"])                                               # (I, H)
        layer_v.append(jnp.concatenate([
            row(qkv_b, _LAYER_V_COLS), row(lp["o_b"], _LAYER_V_COLS),
            row(lp["ln1_g"], _LAYER_V_COLS), row(lp["ln1_b"], _LAYER_V_COLS),
            row(lp["ff1_b"], _LAYER_V_COLS), row(lp["ff2_b"], _LAYER_V_COLS),
            row(lp["ln2_g"], _LAYER_V_COLS), row(lp["ln2_b"], _LAYER_V_COLS)], axis=0))  # (8, 96)

    layer_w = jnp.stack(layer_w)        # (L, H, 4H+I)
    layer_w2 = jnp.stack(layer_w2)      # (L, I, H)
    layer_v = jnp.stack(layer_v)        # (L, 8, 3H)
    head_w = jnp.concatenate([p["pooler_w"], p["cls_w"]], axis=1)     # (H, H+NUM_LABELS)
    head_v = jnp.concatenate([row(p["emb_ln_g"], H), row(p["emb_ln_b"], H),
                              row(p["pooler_b"], H), row(p["cls_b"], H)], axis=0)  # (4, H)
    return layer_w, layer_w2, layer_v, head_w, head_v


def fused_bert_pallas(x_emb, attn_bias, onehot, layer_w, layer_w2, layer_v, head_w, head_v):
    # Single invocation, no grid: every operand is a whole-array VMEM block
    # (weights + activations total ~100 KB, far under any chip's VMEM).
    return pl.pallas_call(
        fused_bert_kernel,
        out_shape=(jax.ShapeDtypeStruct((BATCH, NUM_LABELS), jnp.float32),
                   jax.ShapeDtypeStruct((1, 1), jnp.float32)),
        compiler_params=pltpu.CompilerParams(vmem_limit_bytes=16 * 1024 * 1024),
    )(x_emb, attn_bias, onehot, layer_w, layer_w2, layer_v, head_w, head_v)


# ------------------------------ model (JAX glue) -----------------------------
def init_params(key):
    def dense(k, fan_in, fan_out):
        return jax.random.normal(k, (fan_in, fan_out), jnp.float32) * 0.02

    keys = jax.random.split(key, 8 + NUM_LAYERS)
    params = {
        "word_emb": jax.random.normal(keys[0], (VOCAB, HIDDEN), jnp.float32) * 0.02,
        "pos_emb": jax.random.normal(keys[1], (MAX_POS, HIDDEN), jnp.float32) * 0.02,
        "type_emb": jax.random.normal(keys[2], (TYPE_VOCAB, HIDDEN), jnp.float32) * 0.02,
        "emb_ln_g": jnp.ones((1, HIDDEN), jnp.float32),
        "emb_ln_b": jnp.zeros((1, HIDDEN), jnp.float32),
        "pooler_w": dense(keys[3], HIDDEN, HIDDEN),
        "pooler_b": jnp.zeros((1, HIDDEN), jnp.float32),
        "cls_w": dense(keys[4], HIDDEN, NUM_LABELS),
        "cls_b": jnp.zeros((1, NUM_LABELS), jnp.float32),
        "layers": [],
    }
    for i in range(NUM_LAYERS):
        lk = jax.random.split(keys[8 + i], 6)
        q_w = dense(lk[0], HIDDEN, HIDDEN)
        k_w = dense(lk[1], HIDDEN, HIDDEN)
        v_w = dense(lk[2], HIDDEN, HIDDEN)
        params["layers"].append({
            # Q/K/V fused along N so the kernel does a single [H, 3H] MXU push
            "qkv_w": jnp.concatenate([q_w, k_w, v_w], axis=1),
            "qkv_b": jnp.zeros((1, 3 * HIDDEN), jnp.float32),
            "o_w": dense(lk[3], HIDDEN, HIDDEN), "o_b": jnp.zeros((1, HIDDEN), jnp.float32),
            "ln1_g": jnp.ones((1, HIDDEN), jnp.float32), "ln1_b": jnp.zeros((1, HIDDEN), jnp.float32),
            "ff1_w": dense(lk[4], HIDDEN, INTERMEDIATE), "ff1_b": jnp.zeros((1, INTERMEDIATE), jnp.float32),
            "ff2_w": dense(lk[5], INTERMEDIATE, HIDDEN), "ff2_b": jnp.zeros((1, HIDDEN), jnp.float32),
            "ln2_g": jnp.ones((1, HIDDEN), jnp.float32), "ln2_b": jnp.zeros((1, HIDDEN), jnp.float32),
        })
    return params


def custom_bert_forward(params, input_ids, attention_mask, labels=None):
    B, S = input_ids.shape
    # --- embeddings (gather is JAX glue; everything after is one Pallas kernel) ---
    we = params["word_emb"][input_ids]                        # (B, S, H)
    pe = params["pos_emb"][:S][None, :, :]                    # (1, S, H)
    te = params["type_emb"][0][None, None, :]                 # token_type_ids == 0
    x_emb = (we + pe + te).reshape(B * S, HIDDEN)

    # Block-diagonal additive attention bias over the flattened (B*S) token grid:
    # cross-batch pairs and padded keys get -1e9, so the kernel runs attention as
    # a single (B*S, B*S) score matrix per head (no per-batch loop in-kernel).
    batch_id = jnp.repeat(jnp.arange(B), S)                                       # (B*S,)
    same_batch = batch_id[:, None] == batch_id[None, :]                           # (B*S, B*S)
    key_valid = (attention_mask.reshape(B * S) > 0)[None, :]                      # (1, B*S)
    attn_bias = jnp.where(same_batch & key_valid, 0.0, -1e9).astype(jnp.float32)

    if labels is not None:
        onehot = jax.nn.one_hot(labels, NUM_LABELS, dtype=jnp.float32)
    else:
        onehot = jnp.zeros((B, NUM_LABELS), jnp.float32)

    packed = pack_params(params)
    logits, loss = fused_bert_pallas(x_emb, attn_bias, onehot, *packed)
    return {"loss": (loss[0, 0] if labels is not None else None), "logits": logits}


# ------------------------------------ main -----------------------------------
if __name__ == "__main__":
    key = jax.random.PRNGKey(0)
    kp, ki, kl = jax.random.split(key, 3)

    params = init_params(kp)
    input_ids = jax.random.randint(ki, (BATCH, SEQ), 0, VOCAB, dtype=jnp.int32)
    attention_mask = jnp.ones((BATCH, SEQ), dtype=jnp.int32).at[1, 6:].set(0)
    labels = jax.random.randint(kl, (BATCH,), 0, NUM_LABELS, dtype=jnp.int32)

    fwd = jax.jit(custom_bert_forward)
    out = fwd(params, input_ids, attention_mask, labels)

    jax.block_until_ready(out["logits"])
    jax.block_until_ready(out["loss"])
    assert out["logits"].shape == (BATCH, NUM_LABELS)
    assert out["loss"].shape == ()
    print("KERNEL_OK")
</pallas_src>

<mosaic_0001>
module attributes {stable_mosaic.version = 11 : i64} {
  func.func @fused_bert_kernel(%arg0: memref<16x32xf32, #tpu.memory_space<vmem>>, %arg1: memref<16x16xf32, #tpu.memory_space<vmem>>, %arg2: memref<2x3xf32, #tpu.memory_space<vmem>>, %arg3: memref<2x32x192xf32, #tpu.memory_space<vmem>>, %arg4: memref<2x64x32xf32, #tpu.memory_space<vmem>>, %arg5: memref<2x8x96xf32, #tpu.memory_space<vmem>>, %arg6: memref<32x35xf32, #tpu.memory_space<vmem>>, %arg7: memref<4x32xf32, #tpu.memory_space<vmem>>, %arg8: memref<2x3xf32, #tpu.memory_space<vmem>>, %arg9: memref<1x1xf32, #tpu.memory_space<vmem>>) attributes {dimension_semantics = [], scalar_prefetch = 0 : i64, scratch_operands = 0 : i64, tpu.core_type = #tpu.core_type<tc>} {
    %c0 = arith.constant 0 : index
    %c0_0 = arith.constant 0 : index
    %0 = vector.load %arg7[%c0, %c0_0] : memref<4x32xf32, #tpu.memory_space<vmem>>, vector<4x32xf32>
    %c0_1 = arith.constant 0 : index
    %c0_2 = arith.constant 0 : index
    %1 = vector.load %arg0[%c0_1, %c0_2] : memref<16x32xf32, #tpu.memory_space<vmem>>, vector<16x32xf32>
    %2 = vector.extract_strided_slice %0 {offsets = [0, 0], sizes = [1, 32], strides = [1, 1]} : vector<4x32xf32> to vector<1x32xf32>
    %3 = vector.extract_strided_slice %0 {offsets = [1, 0], sizes = [1, 32], strides = [1, 1]} : vector<4x32xf32> to vector<1x32xf32>
    %cst = arith.constant dense<0.000000e+00> : vector<16xf32>
    %4 = vector.multi_reduction <add>, %1, %cst [1] : vector<16x32xf32> to vector<16xf32>
    %5 = vector.shape_cast %4 : vector<16xf32> to vector<16x1xf32>
    %cst_3 = arith.constant 3.200000e+01 : f32
    %6 = vector.broadcast %cst_3 : f32 to vector<16x1xf32>
    %7 = arith.divf %5, %6 : vector<16x1xf32>
    %8 = vector.broadcast %7 : vector<16x1xf32> to vector<16x32xf32>
    %9 = arith.subf %1, %8 : vector<16x32xf32>
    %10 = arith.mulf %9, %9 : vector<16x32xf32>
    %cst_4 = arith.constant dense<0.000000e+00> : vector<16xf32>
    %11 = vector.multi_reduction <add>, %10, %cst_4 [1] : vector<16x32xf32> to vector<16xf32>
    %12 = vector.shape_cast %11 : vector<16xf32> to vector<16x1xf32>
    %cst_5 = arith.constant 3.200000e+01 : f32
    %13 = vector.broadcast %cst_5 : f32 to vector<16x1xf32>
    %14 = arith.divf %12, %13 : vector<16x1xf32>
    %cst_6 = arith.constant 9.99999996E-13 : f32
    %15 = vector.broadcast %cst_6 : f32 to vector<16x1xf32>
    %16 = arith.addf %14, %15 : vector<16x1xf32>
    %17 = math.rsqrt %16 : vector<16x1xf32>
    %18 = vector.broadcast %17 : vector<16x1xf32> to vector<16x32xf32>
    %19 = arith.mulf %9, %18 : vector<16x32xf32>
    %20 = vector.broadcast %2 : vector<1x32xf32> to vector<16x32xf32>
    %21 = arith.mulf %19, %20 : vector<16x32xf32>
    %22 = vector.broadcast %3 : vector<1x32xf32> to vector<16x32xf32>
    %23 = arith.addf %21, %22 : vector<16x32xf32>
    %c0_7 = arith.constant 0 : index
    %c0_8 = arith.constant 0 : index
    %24 = vector.load %arg1[%c0_7, %c0_8] : memref<16x16xf32, #tpu.memory_space<vmem>>, vector<16x16xf32>
    %c0_9 = arith.constant 0 : index
    %c0_10 = arith.constant 0 : index
    %c0_11 = arith.constant 0 : index
    %25 = vector.load %arg3[%c0_9, %c0_10, %c0_11] : memref<2x32x192xf32, #tpu.memory_space<vmem>>, vector<1x32x192xf32>
    %26 = vector.shape_cast %25 : vector<1x32x192xf32> to vector<32x192xf32>
    %c0_12 = arith.constant 0 : index
    %c0_13 = arith.constant 0 : index
    %c0_14 = arith.constant 0 : index
    %27 = vector.load %arg4[%c0_12, %c0_13, %c0_14] : memref<2x64x32xf32, #tpu.memory_space<vmem>>, vector<1x64x32xf32>
    %28 = vector.shape_cast %27 : vector<1x64x32xf32> to vector<64x32xf32>
    %c0_15 = arith.constant 0 : index
    %c0_16 = arith.constant 0 : index
    %c0_17 = arith.constant 0 : index
    %29 = vector.load %arg5[%c0_15, %c0_16, %c0_17] : memref<2x8x96xf32, #tpu.memory_space<vmem>>, vector<1x8x96xf32>
    %30 = vector.shape_cast %29 : vector<1x8x96xf32> to vector<8x96xf32>
    %31 = vector.extract_strided_slice %26 {offsets = [0, 0], sizes = [32, 96], strides = [1, 1]} : vector<32x192xf32> to vector<32x96xf32>
    %32 = vector.extract_strided_slice %26 {offsets = [0, 96], sizes = [32, 32], strides = [1, 1]} : vector<32x192xf32> to vector<32x32xf32>
    %33 = vector.extract_strided_slice %26 {offsets = [0, 128], sizes = [32, 64], strides = [1, 1]} : vector<32x192xf32> to vector<32x64xf32>
    %34 = vector.extract_strided_slice %30 {offsets = [0, 0], sizes = [1, 96], strides = [1, 1]} : vector<8x96xf32> to vector<1x96xf32>
    %35 = vector.extract_strided_slice %30 {offsets = [1, 0], sizes = [1, 32], strides = [1, 1]} : vector<8x96xf32> to vector<1x32xf32>
    %36 = vector.extract_strided_slice %30 {offsets = [2, 0], sizes = [1, 32], strides = [1, 1]} : vector<8x96xf32> to vector<1x32xf32>
    %37 = vector.extract_strided_slice %30 {offsets = [3, 0], sizes = [1, 32], strides = [1, 1]} : vector<8x96xf32> to vector<1x32xf32>
    %38 = vector.extract_strided_slice %30 {offsets = [4, 0], sizes = [1, 64], strides = [1, 1]} : vector<8x96xf32> to vector<1x64xf32>
    %39 = vector.extract_strided_slice %30 {offsets = [5, 0], sizes = [1, 32], strides = [1, 1]} : vector<8x96xf32> to vector<1x32xf32>
    %40 = vector.extract_strided_slice %30 {offsets = [6, 0], sizes = [1, 32], strides = [1, 1]} : vector<8x96xf32> to vector<1x32xf32>
    %41 = vector.extract_strided_slice %30 {offsets = [7, 0], sizes = [1, 32], strides = [1, 1]} : vector<8x96xf32> to vector<1x32xf32>
    %cst_18 = arith.constant dense<0.000000e+00> : vector<16x96xf32>
    %42 = tpu.matmul %23, %31, %cst_18 {dimension_numbers = #tpu.dot_dimension_numbers<[1], [0], [0], [1], [0, 0, 1, 1], [], []>} : vector<16x32xf32>, vector<32x96xf32>, vector<16x96xf32> -> vector<16x96xf32>
    %43 = vector.broadcast %34 : vector<1x96xf32> to vector<16x96xf32>
    %44 = arith.addf %42, %43 : vector<16x96xf32>
    %45 = vector.extract_strided_slice %44 {offsets = [0, 0], sizes = [16, 16], strides = [1, 1]} : vector<16x96xf32> to vector<16x16xf32>
    %46 = vector.extract_strided_slice %44 {offsets = [0, 32], sizes = [16, 16], strides = [1, 1]} : vector<16x96xf32> to vector<16x16xf32>
    %47 = vector.extract_strided_slice %44 {offsets = [0, 64], sizes = [16, 16], strides = [1, 1]} : vector<16x96xf32> to vector<16x16xf32>
    %cst_19 = arith.constant dense<0.000000e+00> : vector<16x16xf32>
    %48 = tpu.matmul %45, %46, %cst_19 {dimension_numbers = #tpu.dot_dimension_numbers<[1], [1], [0], [0], [0, 0, 1, 0], [], []>} : vector<16x16xf32>, vector<16x16xf32>, vector<16x16xf32> -> vector<16x16xf32>
    %49 = arith.addf %48, %24 : vector<16x16xf32>
    %cst_20 = arith.constant dense<0xFF800000> : vector<16xf32>
    %50 = vector.multi_reduction <maximumf>, %49, %cst_20 [1] : vector<16x16xf32> to vector<16xf32>
    %51 = vector.shape_cast %50 : vector<16xf32> to vector<16x1xf32>
    %52 = vector.broadcast %51 : vector<16x1xf32> to vector<16x16xf32>
    %53 = arith.subf %49, %52 : vector<16x16xf32>
    %54 = math.exp %53 : vector<16x16xf32>
    %cst_21 = arith.constant dense<0.000000e+00> : vector<16xf32>
    %55 = vector.multi_reduction <add>, %54, %cst_21 [1] : vector<16x16xf32> to vector<16xf32>
    %56 = vector.shape_cast %55 : vector<16xf32> to vector<16x1xf32>
    %57 = tpu.reciprocal %56 {approx = true} : vector<16x1xf32> -> vector<16x1xf32>
    %58 = vector.broadcast %57 : vector<16x1xf32> to vector<16x16xf32>
    %59 = arith.mulf %54, %58 : vector<16x16xf32>
    %cst_22 = arith.constant dense<0.000000e+00> : vector<16x16xf32>
    %60 = tpu.matmul %59, %47, %cst_22 {dimension_numbers = #tpu.dot_dimension_numbers<[1], [0], [0], [1], [0, 0, 1, 1], [], []>} : vector<16x16xf32>, vector<16x16xf32>, vector<16x16xf32> -> vector<16x16xf32>
    %61 = vector.extract_strided_slice %44 {offsets = [0, 16], sizes = [16, 16], strides = [1, 1]} : vector<16x96xf32> to vector<16x16xf32>
    %62 = vector.extract_strided_slice %44 {offsets = [0, 48], sizes = [16, 16], strides = [1, 1]} : vector<16x96xf32> to vector<16x16xf32>
    %63 = vector.extract_strided_slice %44 {offsets = [0, 80], sizes = [16, 16], strides = [1, 1]} : vector<16x96xf32> to vector<16x16xf32>
    %cst_23 = arith.constant dense<0.000000e+00> : vector<16x16xf32>
    %64 = tpu.matmul %61, %62, %cst_23 {dimension_numbers = #tpu.dot_dimension_numbers<[1], [1], [0], [0], [0, 0, 1, 0], [], []>} : vector<16x16xf32>, vector<16x16xf32>, vector<16x16xf32> -> vector<16x16xf32>
    %65 = arith.addf %64, %24 : vector<16x16xf32>
    %cst_24 = arith.constant dense<0xFF800000> : vector<16xf32>
    %66 = vector.multi_reduction <maximumf>, %65, %cst_24 [1] : vector<16x16xf32> to vector<16xf32>
    %67 = vector.shape_cast %66 : vector<16xf32> to vector<16x1xf32>
    %68 = vector.broadcast %67 : vector<16x1xf32> to vector<16x16xf32>
    %69 = arith.subf %65, %68 : vector<16x16xf32>
    %70 = math.exp %69 : vector<16x16xf32>
    %cst_25 = arith.constant dense<0.000000e+00> : vector<16xf32>
    %71 = vector.multi_reduction <add>, %70, %cst_25 [1] : vector<16x16xf32> to vector<16xf32>
    %72 = vector.shape_cast %71 : vector<16xf32> to vector<16x1xf32>
    %73 = tpu.reciprocal %72 {approx = true} : vector<16x1xf32> -> vector<16x1xf32>
    %74 = vector.broadcast %73 : vector<16x1xf32> to vector<16x16xf32>
    %75 = arith.mulf %70, %74 : vector<16x16xf32>
    %cst_26 = arith.constant dense<0.000000e+00> : vector<16x16xf32>
    %76 = tpu.matmul %75, %63, %cst_26 {dimension_numbers = #tpu.dot_dimension_numbers<[1], [0], [0], [1], [0, 0, 1, 1], [], []>} : vector<16x16xf32>, vector<16x16xf32>, vector<16x16xf32> -> vector<16x16xf32>
    %77 = tpu.concatenate %60, %76 in 1 : vector<16x16xf32>, vector<16x16xf32> -> vector<16x32xf32>
    %cst_27 = arith.constant dense<0.000000e+00> : vector<16x32xf32>
    %78 = tpu.matmul %77, %32, %cst_27 {dimension_numbers = #tpu.dot_dimension_numbers<[1], [0], [0], [1], [0, 0, 1, 1], [], []>} : vector<16x32xf32>, vector<32x32xf32>, vector<16x32xf32> -> vector<16x32xf32>
    %79 = vector.broadcast %35 : vector<1x32xf32> to vector<16x32xf32>
    %80 = arith.addf %78, %79 : vector<16x32xf32>
    %81 = arith.addf %23, %80 : vector<16x32xf32>
    %cst_28 = arith.constant dense<0.000000e+00> : vector<16xf32>
    %82 = vector.multi_reduction <add>, %81, %cst_28 [1] : vector<16x32xf32> to vector<16xf32>
    %83 = vector.shape_cast %82 : vector<16xf32> to vector<16x1xf32>
    %cst_29 = arith.constant 3.200000e+01 : f32
    %84 = vector.broadcast %cst_29 : f32 to vector<16x1xf32>
    %85 = arith.divf %83, %84 : vector<16x1xf32>
    %86 = vector.broadcast %85 : vector<16x1xf32> to vector<16x32xf32>
    %87 = arith.subf %81, %86 : vector<16x32xf32>
    %88 = arith.mulf %87, %87 : vector<16x32xf32>
    %cst_30 = arith.constant dense<0.000000e+00> : vector<16xf32>
    %89 = vector.multi_reduction <add>, %88, %cst_30 [1] : vector<16x32xf32> to vector<16xf32>
    %90 = vector.shape_cast %89 : vector<16xf32> to vector<16x1xf32>
    %cst_31 = arith.constant 3.200000e+01 : f32
    %91 = vector.broadcast %cst_31 : f32 to vector<16x1xf32>
    %92 = arith.divf %90, %91 : vector<16x1xf32>
    %cst_32 = arith.constant 9.99999996E-13 : f32
    %93 = vector.broadcast %cst_32 : f32 to vector<16x1xf32>
    %94 = arith.addf %92, %93 : vector<16x1xf32>
    %95 = math.rsqrt %94 : vector<16x1xf32>
    %96 = vector.broadcast %95 : vector<16x1xf32> to vector<16x32xf32>
    %97 = arith.mulf %87, %96 : vector<16x32xf32>
    %98 = vector.broadcast %36 : vector<1x32xf32> to vector<16x32xf32>
    %99 = arith.mulf %97, %98 : vector<16x32xf32>
    %100 = vector.broadcast %37 : vector<1x32xf32> to vector<16x32xf32>
    %101 = arith.addf %99, %100 : vector<16x32xf32>
    %cst_33 = arith.constant dense<0.000000e+00> : vector<16x64xf32>
    %102 = tpu.matmul %101, %33, %cst_33 {dimension_numbers = #tpu.dot_dimension_numbers<[1], [0], [0], [1], [0, 0, 1, 1], [], []>} : vector<16x32xf32>, vector<32x64xf32>, vector<16x64xf32> -> vector<16x64xf32>
    %103 = vector.broadcast %38 : vector<1x64xf32> to vector<16x64xf32>
    %104 = arith.addf %102, %103 : vector<16x64xf32>
    %cst_34 = arith.constant 5.000000e-01 : f32
    %105 = vector.broadcast %cst_34 : f32 to vector<16x64xf32>
    %106 = arith.mulf %105, %104 : vector<16x64xf32>
    %cst_35 = arith.constant 4.471500e-02 : f32
    %107 = vector.broadcast %cst_35 : f32 to vector<16x64xf32>
    %108 = arith.mulf %107, %104 : vector<16x64xf32>
    %109 = arith.mulf %108, %104 : vector<16x64xf32>
    %110 = arith.mulf %109, %104 : vector<16x64xf32>
    %111 = arith.addf %104, %110 : vector<16x64xf32>
    %cst_36 = arith.constant 0.797884583 : f32
    %112 = vector.broadcast %cst_36 : f32 to vector<16x64xf32>
    %113 = arith.mulf %112, %111 : vector<16x64xf32>
    %114 = math.tanh %113 : vector<16x64xf32>
    %cst_37 = arith.constant 1.000000e+00 : f32
    %115 = vector.broadcast %cst_37 : f32 to vector<16x64xf32>
    %116 = arith.addf %115, %114 : vector<16x64xf32>
    %117 = arith.mulf %106, %116 : vector<16x64xf32>
    %cst_38 = arith.constant dense<0.000000e+00> : vector<16x32xf32>
    %118 = tpu.matmul %117, %28, %cst_38 {dimension_numbers = #tpu.dot_dimension_numbers<[1], [0], [0], [1], [0, 0, 1, 1], [], []>} : vector<16x64xf32>, vector<64x32xf32>, vector<16x32xf32> -> vector<16x32xf32>
    %119 = vector.broadcast %39 : vector<1x32xf32> to vector<16x32xf32>
    %120 = arith.addf %118, %119 : vector<16x32xf32>
    %121 = arith.addf %101, %120 : vector<16x32xf32>
    %cst_39 = arith.constant dense<0.000000e+00> : vector<16xf32>
    %122 = vector.multi_reduction <add>, %121, %cst_39 [1] : vector<16x32xf32> to vector<16xf32>
    %123 = vector.shape_cast %122 : vector<16xf32> to vector<16x1xf32>
    %cst_40 = arith.constant 3.200000e+01 : f32
    %124 = vector.broadcast %cst_40 : f32 to vector<16x1xf32>
    %125 = arith.divf %123, %124 : vector<16x1xf32>
    %126 = vector.broadcast %125 : vector<16x1xf32> to vector<16x32xf32>
    %127 = arith.subf %121, %126 : vector<16x32xf32>
    %128 = arith.mulf %127, %127 : vector<16x32xf32>
    %cst_41 = arith.constant dense<0.000000e+00> : vector<16xf32>
    %129 = vector.multi_reduction <add>, %128, %cst_41 [1] : vector<16x32xf32> to vector<16xf32>
    %130 = vector.shape_cast %129 : vector<16xf32> to vector<16x1xf32>
    %cst_42 = arith.constant 3.200000e+01 : f32
    %131 = vector.broadcast %cst_42 : f32 to vector<16x1xf32>
    %132 = arith.divf %130, %131 : vector<16x1xf32>
    %cst_43 = arith.constant 9.99999996E-13 : f32
    %133 = vector.broadcast %cst_43 : f32 to vector<16x1xf32>
    %134 = arith.addf %132, %133 : vector<16x1xf32>
    %135 = math.rsqrt %134 : vector<16x1xf32>
    %136 = vector.broadcast %135 : vector<16x1xf32> to vector<16x32xf32>
    %137 = arith.mulf %127, %136 : vector<16x32xf32>
    %138 = vector.broadcast %40 : vector<1x32xf32> to vector<16x32xf32>
    %139 = arith.mulf %137, %138 : vector<16x32xf32>
    %140 = vector.broadcast %41 : vector<1x32xf32> to vector<16x32xf32>
    %141 = arith.addf %139, %140 : vector<16x32xf32>
    %c1 = arith.constant 1 : index
    %c0_44 = arith.constant 0 : index
    %c0_45 = arith.constant 0 : index
    %142 = vector.load %arg3[%c1, %c0_44, %c0_45] : memref<2x32x192xf32, #tpu.memory_space<vmem>>, vector<1x32x192xf32>
    %143 = vector.shape_cast %142 : vector<1x32x192xf32> to vector<32x192xf32>
    %c1_46 = arith.constant 1 : index
    %c0_47 = arith.constant 0 : index
    %c0_48 = arith.constant 0 : index
    %144 = vector.load %arg4[%c1_46, %c0_47, %c0_48] : memref<2x64x32xf32, #tpu.memory_space<vmem>>, vector<1x64x32xf32>
    %145 = vector.shape_cast %144 : vector<1x64x32xf32> to vector<64x32xf32>
    %c1_49 = arith.constant 1 : index
    %c0_50 = arith.constant 0 : index
    %c0_51 = arith.constant 0 : index
    %146 = vector.load %arg5[%c1_49, %c0_50, %c0_51] : memref<2x8x96xf32, #tpu.memory_space<vmem>>, vector<1x8x96xf32>
    %147 = vector.shape_cast %146 : vector<1x8x96xf32> to vector<8x96xf32>
    %148 = vector.extract_strided_slice %143 {offsets = [0, 0], sizes = [32, 96], strides = [1, 1]} : vector<32x192xf32> to vector<32x96xf32>
    %149 = vector.extract_strided_slice %143 {offsets = [0, 96], sizes = [32, 32], strides = [1, 1]} : vector<32x192xf32> to vector<32x32xf32>
    %150 = vector.extract_strided_slice %143 {offsets = [0, 128], sizes = [32, 64], strides = [1, 1]} : vector<32x192xf32> to vector<32x64xf32>
    %151 = vector.extract_strided_slice %147 {offsets = [0, 0], sizes = [1, 96], strides = [1, 1]} : vector<8x96xf32> to vector<1x96xf32>
    %152 = vector.extract_strided_slice %147 {offsets = [1, 0], sizes = [1, 32], strides = [1, 1]} : vector<8x96xf32> to vector<1x32xf32>
    %153 = vector.extract_strided_slice %147 {offsets = [2, 0], sizes = [1, 32], strides = [1, 1]} : vector<8x96xf32> to vector<1x32xf32>
    %154 = vector.extract_strided_slice %147 {offsets = [3, 0], sizes = [1, 32], strides = [1, 1]} : vector<8x96xf32> to vector<1x32xf32>
    %155 = vector.extract_strided_slice %147 {offsets = [4, 0], sizes = [1, 64], strides = [1, 1]} : vector<8x96xf32> to vector<1x64xf32>
    %156 = vector.extract_strided_slice %147 {offsets = [5, 0], sizes = [1, 32], strides = [1, 1]} : vector<8x96xf32> to vector<1x32xf32>
    %157 = vector.extract_strided_slice %147 {offsets = [6, 0], sizes = [1, 32], strides = [1, 1]} : vector<8x96xf32> to vector<1x32xf32>
    %158 = vector.extract_strided_slice %147 {offsets = [7, 0], sizes = [1, 32], strides = [1, 1]} : vector<8x96xf32> to vector<1x32xf32>
    %cst_52 = arith.constant dense<0.000000e+00> : vector<16x96xf32>
    %159 = tpu.matmul %141, %148, %cst_52 {dimension_numbers = #tpu.dot_dimension_numbers<[1], [0], [0], [1], [0, 0, 1, 1], [], []>} : vector<16x32xf32>, vector<32x96xf32>, vector<16x96xf32> -> vector<16x96xf32>
    %160 = vector.broadcast %151 : vector<1x96xf32> to vector<16x96xf32>
    %161 = arith.addf %159, %160 : vector<16x96xf32>
    %162 = vector.extract_strided_slice %161 {offsets = [0, 0], sizes = [16, 16], strides = [1, 1]} : vector<16x96xf32> to vector<16x16xf32>
    %163 = vector.extract_strided_slice %161 {offsets = [0, 32], sizes = [16, 16], strides = [1, 1]} : vector<16x96xf32> to vector<16x16xf32>
    %164 = vector.extract_strided_slice %161 {offsets = [0, 64], sizes = [16, 16], strides = [1, 1]} : vector<16x96xf32> to vector<16x16xf32>
    %cst_53 = arith.constant dense<0.000000e+00> : vector<16x16xf32>
    %165 = tpu.matmul %162, %163, %cst_53 {dimension_numbers = #tpu.dot_dimension_numbers<[1], [1], [0], [0], [0, 0, 1, 0], [], []>} : vector<16x16xf32>, vector<16x16xf32>, vector<16x16xf32> -> vector<16x16xf32>
    %166 = arith.addf %165, %24 : vector<16x16xf32>
    %cst_54 = arith.constant dense<0xFF800000> : vector<16xf32>
    %167 = vector.multi_reduction <maximumf>, %166, %cst_54 [1] : vector<16x16xf32> to vector<16xf32>
    %168 = vector.shape_cast %167 : vector<16xf32> to vector<16x1xf32>
    %169 = vector.broadcast %168 : vector<16x1xf32> to vector<16x16xf32>
    %170 = arith.subf %166, %169 : vector<16x16xf32>
    %171 = math.exp %170 : vector<16x16xf32>
    %cst_55 = arith.constant dense<0.000000e+00> : vector<16xf32>
    %172 = vector.multi_reduction <add>, %171, %cst_55 [1] : vector<16x16xf32> to vector<16xf32>
    %173 = vector.shape_cast %172 : vector<16xf32> to vector<16x1xf32>
    %174 = tpu.reciprocal %173 {approx = true} : vector<16x1xf32> -> vector<16x1xf32>
    %175 = vector.broadcast %174 : vector<16x1xf32> to vector<16x16xf32>
    %176 = arith.mulf %171, %175 : vector<16x16xf32>
    %cst_56 = arith.constant dense<0.000000e+00> : vector<16x16xf32>
    %177 = tpu.matmul %176, %164, %cst_56 {dimension_numbers = #tpu.dot_dimension_numbers<[1], [0], [0], [1], [0, 0, 1, 1], [], []>} : vector<16x16xf32>, vector<16x16xf32>, vector<16x16xf32> -> vector<16x16xf32>
    %178 = vector.extract_strided_slice %161 {offsets = [0, 16], sizes = [16, 16], strides = [1, 1]} : vector<16x96xf32> to vector<16x16xf32>
    %179 = vector.extract_strided_slice %161 {offsets = [0, 48], sizes = [16, 16], strides = [1, 1]} : vector<16x96xf32> to vector<16x16xf32>
    %180 = vector.extract_strided_slice %161 {offsets = [0, 80], sizes = [16, 16], strides = [1, 1]} : vector<16x96xf32> to vector<16x16xf32>
    %cst_57 = arith.constant dense<0.000000e+00> : vector<16x16xf32>
    %181 = tpu.matmul %178, %179, %cst_57 {dimension_numbers = #tpu.dot_dimension_numbers<[1], [1], [0], [0], [0, 0, 1, 0], [], []>} : vector<16x16xf32>, vector<16x16xf32>, vector<16x16xf32> -> vector<16x16xf32>
    %182 = arith.addf %181, %24 : vector<16x16xf32>
    %cst_58 = arith.constant dense<0xFF800000> : vector<16xf32>
    %183 = vector.multi_reduction <maximumf>, %182, %cst_58 [1] : vector<16x16xf32> to vector<16xf32>
    %184 = vector.shape_cast %183 : vector<16xf32> to vector<16x1xf32>
    %185 = vector.broadcast %184 : vector<16x1xf32> to vector<16x16xf32>
    %186 = arith.subf %182, %185 : vector<16x16xf32>
    %187 = math.exp %186 : vector<16x16xf32>
    %cst_59 = arith.constant dense<0.000000e+00> : vector<16xf32>
    %188 = vector.multi_reduction <add>, %187, %cst_59 [1] : vector<16x16xf32> to vector<16xf32>
    %189 = vector.shape_cast %188 : vector<16xf32> to vector<16x1xf32>
    %190 = tpu.reciprocal %189 {approx = true} : vector<16x1xf32> -> vector<16x1xf32>
    %191 = vector.broadcast %190 : vector<16x1xf32> to vector<16x16xf32>
    %192 = arith.mulf %187, %191 : vector<16x16xf32>
    %cst_60 = arith.constant dense<0.000000e+00> : vector<16x16xf32>
    %193 = tpu.matmul %192, %180, %cst_60 {dimension_numbers = #tpu.dot_dimension_numbers<[1], [0], [0], [1], [0, 0, 1, 1], [], []>} : vector<16x16xf32>, vector<16x16xf32>, vector<16x16xf32> -> vector<16x16xf32>
    %194 = tpu.concatenate %177, %193 in 1 : vector<16x16xf32>, vector<16x16xf32> -> vector<16x32xf32>
    %cst_61 = arith.constant dense<0.000000e+00> : vector<16x32xf32>
    %195 = tpu.matmul %194, %149, %cst_61 {dimension_numbers = #tpu.dot_dimension_numbers<[1], [0], [0], [1], [0, 0, 1, 1], [], []>} : vector<16x32xf32>, vector<32x32xf32>, vector<16x32xf32> -> vector<16x32xf32>
    %196 = vector.broadcast %152 : vector<1x32xf32> to vector<16x32xf32>
    %197 = arith.addf %195, %196 : vector<16x32xf32>
    %198 = arith.addf %141, %197 : vector<16x32xf32>
    %cst_62 = arith.constant dense<0.000000e+00> : vector<16xf32>
    %199 = vector.multi_reduction <add>, %198, %cst_62 [1] : vector<16x32xf32> to vector<16xf32>
    %200 = vector.shape_cast %199 : vector<16xf32> to vector<16x1xf32>
    %cst_63 = arith.constant 3.200000e+01 : f32
    %201 = vector.broadcast %cst_63 : f32 to vector<16x1xf32>
    %202 = arith.divf %200, %201 : vector<16x1xf32>
    %203 = vector.broadcast %202 : vector<16x1xf32> to vector<16x32xf32>
    %204 = arith.subf %198, %203 : vector<16x32xf32>
    %205 = arith.mulf %204, %204 : vector<16x32xf32>
    %cst_64 = arith.constant dense<0.000000e+00> : vector<16xf32>
    %206 = vector.multi_reduction <add>, %205, %cst_64 [1] : vector<16x32xf32> to vector<16xf32>
    %207 = vector.shape_cast %206 : vector<16xf32> to vector<16x1xf32>
    %cst_65 = arith.constant 3.200000e+01 : f32
    %208 = vector.broadcast %cst_65 : f32 to vector<16x1xf32>
    %209 = arith.divf %207, %208 : vector<16x1xf32>
    %cst_66 = arith.constant 9.99999996E-13 : f32
    %210 = vector.broadcast %cst_66 : f32 to vector<16x1xf32>
    %211 = arith.addf %209, %210 : vector<16x1xf32>
    %212 = math.rsqrt %211 : vector<16x1xf32>
    %213 = vector.broadcast %212 : vector<16x1xf32> to vector<16x32xf32>
    %214 = arith.mulf %204, %213 : vector<16x32xf32>
    %215 = vector.broadcast %153 : vector<1x32xf32> to vector<16x32xf32>
    %216 = arith.mulf %214, %215 : vector<16x32xf32>
    %217 = vector.broadcast %154 : vector<1x32xf32> to vector<16x32xf32>
    %218 = arith.addf %216, %217 : vector<16x32xf32>
    %cst_67 = arith.constant dense<0.000000e+00> : vector<16x64xf32>
    %219 = tpu.matmul %218, %150, %cst_67 {dimension_numbers = #tpu.dot_dimension_numbers<[1], [0], [0], [1], [0, 0, 1, 1], [], []>} : vector<16x32xf32>, vector<32x64xf32>, vector<16x64xf32> -> vector<16x64xf32>
    %220 = vector.broadcast %155 : vector<1x64xf32> to vector<16x64xf32>
    %221 = arith.addf %219, %220 : vector<16x64xf32>
    %cst_68 = arith.constant 5.000000e-01 : f32
    %222 = vector.broadcast %cst_68 : f32 to vector<16x64xf32>
    %223 = arith.mulf %222, %221 : vector<16x64xf32>
    %cst_69 = arith.constant 4.471500e-02 : f32
    %224 = vector.broadcast %cst_69 : f32 to vector<16x64xf32>
    %225 = arith.mulf %224, %221 : vector<16x64xf32>
    %226 = arith.mulf %225, %221 : vector<16x64xf32>
    %227 = arith.mulf %226, %221 : vector<16x64xf32>
    %228 = arith.addf %221, %227 : vector<16x64xf32>
    %cst_70 = arith.constant 0.797884583 : f32
    %229 = vector.broadcast %cst_70 : f32 to vector<16x64xf32>
    %230 = arith.mulf %229, %228 : vector<16x64xf32>
    %231 = math.tanh %230 : vector<16x64xf32>
    %cst_71 = arith.constant 1.000000e+00 : f32
    %232 = vector.broadcast %cst_71 : f32 to vector<16x64xf32>
    %233 = arith.addf %232, %231 : vector<16x64xf32>
    %234 = arith.mulf %223, %233 : vector<16x64xf32>
    %cst_72 = arith.constant dense<0.000000e+00> : vector<16x32xf32>
    %235 = tpu.matmul %234, %145, %cst_72 {dimension_numbers = #tpu.dot_dimension_numbers<[1], [0], [0], [1], [0, 0, 1, 1], [], []>} : vector<16x64xf32>, vector<64x32xf32>, vector<16x32xf32> -> vector<16x32xf32>
    %236 = vector.broadcast %156 : vector<1x32xf32> to vector<16x32xf32>
    %237 = arith.addf %235, %236 : vector<16x32xf32>
    %238 = arith.addf %218, %237 : vector<16x32xf32>
    %cst_73 = arith.constant dense<0.000000e+00> : vector<16xf32>
    %239 = vector.multi_reduction <add>, %238, %cst_73 [1] : vector<16x32xf32> to vector<16xf32>
    %240 = vector.shape_cast %239 : vector<16xf32> to vector<16x1xf32>
    %cst_74 = arith.constant 3.200000e+01 : f32
    %241 = vector.broadcast %cst_74 : f32 to vector<16x1xf32>
    %242 = arith.divf %240, %241 : vector<16x1xf32>
    %243 = vector.broadcast %242 : vector<16x1xf32> to vector<16x32xf32>
    %244 = arith.subf %238, %243 : vector<16x32xf32>
    %245 = arith.mulf %244, %244 : vector<16x32xf32>
    %cst_75 = arith.constant dense<0.000000e+00> : vector<16xf32>
    %246 = vector.multi_reduction <add>, %245, %cst_75 [1] : vector<16x32xf32> to vector<16xf32>
    %247 = vector.shape_cast %246 : vector<16xf32> to vector<16x1xf32>
    %cst_76 = arith.constant 3.200000e+01 : f32
    %248 = vector.broadcast %cst_76 : f32 to vector<16x1xf32>
    %249 = arith.divf %247, %248 : vector<16x1xf32>
    %cst_77 = arith.constant 9.99999996E-13 : f32
    %250 = vector.broadcast %cst_77 : f32 to vector<16x1xf32>
    %251 = arith.addf %249, %250 : vector<16x1xf32>
    %252 = math.rsqrt %251 : vector<16x1xf32>
    %253 = vector.broadcast %252 : vector<16x1xf32> to vector<16x32xf32>
    %254 = arith.mulf %244, %253 : vector<16x32xf32>
    %255 = vector.broadcast %157 : vector<1x32xf32> to vector<16x32xf32>
    %256 = arith.mulf %254, %255 : vector<16x32xf32>
    %257 = vector.broadcast %158 : vector<1x32xf32> to vector<16x32xf32>
    %258 = arith.addf %256, %257 : vector<16x32xf32>
    %259 = vector.shape_cast %258 : vector<16x32xf32> to vector<2x8x32xf32>
    %260 = vector.extract_strided_slice %259 {offsets = [0, 0, 0], sizes = [2, 1, 32], strides = [1, 1, 1]} : vector<2x8x32xf32> to vector<2x1x32xf32>
    %261 = vector.shape_cast %260 : vector<2x1x32xf32> to vector<2x32xf32>
    %c0_78 = arith.constant 0 : index
    %c0_79 = arith.constant 0 : index
    %262 = vector.load %arg6[%c0_78, %c0_79] : memref<32x35xf32, #tpu.memory_space<vmem>>, vector<32x32xf32>
    %c0_80 = arith.constant 0 : index
    %c32 = arith.constant 32 : index
    %263 = vector.load %arg6[%c0_80, %c32] : memref<32x35xf32, #tpu.memory_space<vmem>>, vector<32x3xf32>
    %cst_81 = arith.constant dense<0.000000e+00> : vector<2x32xf32>
    %264 = tpu.matmul %261, %262, %cst_81 {dimension_numbers = #tpu.dot_dimension_numbers<[1], [0], [0], [1], [0, 0, 1, 1], [], []>} : vector<2x32xf32>, vector<32x32xf32>, vector<2x32xf32> -> vector<2x32xf32>
    %265 = vector.extract_strided_slice %0 {offsets = [2, 0], sizes = [1, 32], strides = [1, 1]} : vector<4x32xf32> to vector<1x32xf32>
    %266 = vector.broadcast %265 : vector<1x32xf32> to vector<2x32xf32>
    %267 = arith.addf %264, %266 : vector<2x32xf32>
    %268 = math.tanh %267 : vector<2x32xf32>
    %cst_82 = arith.constant dense<0.000000e+00> : vector<2x3xf32>
    %269 = tpu.matmul %268, %263, %cst_82 {dimension_numbers = #tpu.dot_dimension_numbers<[1], [0], [0], [1], [0, 0, 1, 1], [], []>} : vector<2x32xf32>, vector<32x3xf32>, vector<2x3xf32> -> vector<2x3xf32>
    %270 = vector.extract_strided_slice %0 {offsets = [3, 0], sizes = [1, 3], strides = [1, 1]} : vector<4x32xf32> to vector<1x3xf32>
    %271 = vector.broadcast %270 : vector<1x3xf32> to vector<2x3xf32>
    %272 = arith.addf %269, %271 : vector<2x3xf32>
    %c0_83 = arith.constant 0 : index
    %c0_84 = arith.constant 0 : index
    %273 = vector.load %arg8[%c0_83, %c0_84] : memref<2x3xf32, #tpu.memory_space<vmem>>, vector<2x3xf32>
    tpu.vector_store %arg8[%c0_83, %c0_84], %272 {strides = array<i32>} : memref<2x3xf32, #tpu.memory_space<vmem>>, vector<2x3xf32>,
    %cst_85 = arith.constant dense<0xFF800000> : vector<2xf32>
    %274 = vector.multi_reduction <maximumf>, %272, %cst_85 [1] : vector<2x3xf32> to vector<2xf32>
    %275 = vector.shape_cast %274 : vector<2xf32> to vector<2x1xf32>
    %276 = vector.broadcast %275 : vector<2x1xf32> to vector<2x3xf32>
    %277 = arith.subf %272, %276 : vector<2x3xf32>
    %278 = math.exp %277 : vector<2x3xf32>
    %cst_86 = arith.constant dense<0.000000e+00> : vector<2xf32>
    %279 = vector.multi_reduction <add>, %278, %cst_86 [1] : vector<2x3xf32> to vector<2xf32>
    %280 = vector.shape_cast %279 : vector<2xf32> to vector<2x1xf32>
    %281 = math.log %280 : vector<2x1xf32>
    %282 = arith.addf %281, %275 : vector<2x1xf32>
    %c0_87 = arith.constant 0 : index
    %c0_88 = arith.constant 0 : index
    %283 = vector.load %arg2[%c0_87, %c0_88] : memref<2x3xf32, #tpu.memory_space<vmem>>, vector<2x3xf32>
    %284 = arith.mulf %272, %283 : vector<2x3xf32>
    %cst_89 = arith.constant dense<0.000000e+00> : vector<2xf32>
    %285 = vector.multi_reduction <add>, %284, %cst_89 [1] : vector<2x3xf32> to vector<2xf32>
    %286 = vector.shape_cast %285 : vector<2xf32> to vector<2x1xf32>
    %287 = arith.subf %282, %286 : vector<2x1xf32>
    %cst_90 = arith.constant dense<0.000000e+00> : vector<1xf32>
    %288 = vector.multi_reduction <add>, %287, %cst_90 [0] : vector<2x1xf32> to vector<1xf32>
    %289 = vector.shape_cast %288 : vector<1xf32> to vector<1x1xf32>
    %cst_91 = arith.constant 5.000000e-01 : f32
    %290 = vector.broadcast %cst_91 : f32 to vector<1x1xf32>
    %291 = arith.mulf %289, %290 : vector<1x1xf32>
    %c0_92 = arith.constant 0 : index
    %c0_93 = arith.constant 0 : index
    %292 = vector.load %arg9[%c0_92, %c0_93] : memref<1x1xf32, #tpu.memory_space<vmem>>, vector<1x1xf32>
    tpu.vector_store %arg9[%c0_92, %c0_93], %291 {strides = array<i32>} : memref<1x1xf32, #tpu.memory_space<vmem>>, vector<1x1xf32>,
    return
  }
}

</mosaic_0001>

<bundles_post_ra>
// kernel: custom_bert_forward.1
= control target key start
LH: loop header
LB: loop body
LE: loop exit
PB: predicated region body
PF: predicated region fallthrough
CT: control target
= control target key end

     0   :  { %15 = vsyncpa [#allocation3], 0  ;;  %vm36_vm0 = vcmask 261120   ;;  %s3044_s0 = inlined_call_operand.vmem [shape: f32[16,32], index: 0, kind: input, shape index: {}]   ;;  %s3045_s1 = inlined_call_operand.vmem [shape: f32[16,16], index: 1, kind: input, shape index: {}]   ;;  %s3046_s2 = inlined_call_operand.vmem [shape: f32[2,3], index: 2, kind: input, shape index: {}]   ;;  %s3047_s3 = inlined_call_operand.vmem [shape: f32[2,32,192], index: 3, kind: input, shape index: {}]   ;;  %s3048_s4 = inlined_call_operand.vmem [shape: f32[2,64,32], index: 4, kind: input, shape index: {}]   ;;  %s3049_s5 = inlined_call_operand.vmem [shape: f32[2,8,96], index: 5, kind: input, shape index: {}]   ;;  %s3050_s6 = inlined_call_operand.vmem [shape: f32[32,35], index: 6, kind: input, shape index: {}]   ;;  %s3051_s7 = inlined_call_operand.vmem [shape: f32[4,32], index: 7, kind: input, shape index: {}]   ;;  %s3052_s8 = inlined_call_operand.hbm [shape: f32[2,3], index: 8, kind: output, shape index: {0}]   ;;  %s3053_s9 = inlined_call_operand.hbm [shape: f32[1,1], index: 9, kind: output, shape index: {1}]  }
   0x1   :  { %v34_v0 = vld [vmem:[%s3044_s0] sm:$0xff]  ;;  %v35_v1 = vld [vmem:[%s3044_s0 + $0x8] sm:$0xff] }
   0x2   :  { %16 = vsyncpa [#allocation5], 0  ;;  %v37_v2 = vsel %vm36_vm0, %v34_v0, 0.0  ;;  %v40_v3 = vsel %vm36_vm0, %v35_v1, 0.0  ;;  %v2614_v14 = vld [vmem:[%s3047_s3 + $0x30] sm:$0xff]  ;;  %v2619_v15 = vld [vmem:[%s3047_s3 + $0x20] sm:$0xff]  ;;  %v64_v23 = vlaneseq }
   0x3   :  { %38 = vadd.xlane.f32.xlu0 %v37_v2  ;;  %2236 = vmatprep.subr.mxu0 %v2614_v14  ;;  %v2626_v16 = vld [vmem:[%s3047_s3 + $0x10] sm:$0xff]  ;;  %v2635_v17 = vld [vmem:[%s3047_s3] sm:$0xff]  ;;  %vm186_vm1 = vcmask 130048   ;;  %s2540_s24 = smov 96   ;;  %s2541_s25 = smov 112   ;;  %v2700_v51 = vld [vmem:[%s3045_s1 + $0x8] sm:$0xff] }
   0x4   :  { %2237 = vmatpush3.msra.mxu0 %v2614_v14  ;;  %v2639_v25 = vshrl.u32 %v64_v23, 7  ;;  %v33_v27 = vld [vmem:[%s3051_s7] sm:$0xf]  ;;  %s2542_s26 = smov 80   ;;  %s2544_s10 = smov 48   ;;  %vm837_vm2 = vcmask 523264  }
   0x5   :  { %2238 = vmatprep.subr.mxu0 %v2619_v15  ;;  %v2663_v39 = vld [vmem:[%s3049_s5] sm:$0xff]  ;;  %s2545_s11 = smov 32   ;;  %s2546_s12 = smov 16   ;;  %vm2548_vm3 = vmmov 0   ;;  %vm1852_vm4 = vcmask 1041409   ;;  %vm2020_vm5 = vcmask 17408  }
   0x6   :  { %2239 = vmatpush3.msra.mxu0 %v2619_v15  ;;  %v2642_v26 = vsub.s32 0, %v2639_v25  ;;  %v2648_v28 = vsub.s32 1, %v2639_v25  ;;  %v2705_v53 = vld [vmem:[%s3045_s1] sm:$0xff]  ;;  %s2543_s1 = smov 64  }
   0x7   :  { %41 = vadd.xlane.f32.xlu0 %v40_v3  ;;  %2240 = vmatprep.subr.mxu0 %v2626_v16 }
   0x8   :  { %2241 = vmatpush3.msra.mxu0 %v2626_v16  ;;  %v67_v29 = vrot.slane %v33_v27, %v2642_v26  ;;  %v73_v32 = vrot.slane %v33_v27, %v2648_v28  ;;  %v98_v40 = vrot.slane %v2663_v39, %v2642_v26 }
   0x9   :  { %2242 = vmatprep.subr.mxu0 %v2635_v17 }
   0xa   :  { %2243 = vmatpush3.msra.mxu0 %v2635_v17 }
  0x8c   :  { %v39_v4 = vpop.xlane.xlu0 %38 }
  0x8d   :  { %v44_v5 = vmul.f32 0.03125, %v39_v4 }
  0x8f   :  { %v46_v6 = vsub.f32 %v34_v0, %v44_v5 }
  0x90   :  { %v42_v7 = vpop.xlane.xlu0 %41 }
  0x91   :  { %v45_v8 = vmul.f32 0.03125, %v42_v7  ;;  %v48_v9 = vmul.f32 %v46_v6, %v46_v6 }
  0x93   :  { %v47_v10 = vsub.f32 %v35_v1, %v45_v8  ;;  %v50_v11 = vsel %vm36_vm0, %v48_v9, 0.0 }
  0x94   :  { %51 = vadd.xlane.f32.xlu1 %v50_v11 }
  0x95   :  { %v49_v12 = vmul.f32 %v47_v10, %v47_v10 }
  0x97   :  { %v53_v13 = vsel %vm36_vm0, %v49_v12, 0.0 }
  0x98   :  { %54 = vadd.xlane.f32.xlu1 %v53_v13 }
 0x11d   :  { %v52_v18 = vpop.xlane.xlu1 %51 }
 0x11e   :  { %v56_v19 = vmul.f32 0.03125, %v52_v18 }
 0x120   :  { %v58_v20 = vadd.f32 1e-12, %v56_v19 }
 0x121   :  { %v55_v21 = vpop.xlane.xlu1 %54 }
 0x122   :  { %2429 = vrsqrt.f32 %v58_v20  ;;  %v57_v22 = vmul.f32 0.03125, %v55_v21 }
 0x124   :  { %v59_v24 = vadd.f32 1e-12, %v57_v22 }
 0x126   :  { %2431 = vrsqrt.f32 %v59_v24 }
 0x12f   :  { %v2430_v30 = vpop.eup %2429 }
 0x130   :  { %v62_v31 = vmul.f32 %v2430_v30, %v46_v6 }
 0x132   :  { %v68_v33 = vmul.f32 %v67_v29, %v62_v31 }
 0x133   :  { %v2432_v34 = vpop.eup %2431 }
 0x134   :  { %v63_v35 = vmul.f32 %v2432_v34, %v47_v10  ;;  %v2652_v36 = vadd.f32 %v73_v32, %v68_v33 }
 0x136   :  { %v69_v37 = vmul.f32 %v67_v29, %v63_v35  ;;  %2244 = vmatprep.mubr.msk.f32.mxu0 %vm36_vm0, %v2652_v36 }
 0x138   :  { %v2656_v38 = vadd.f32 %v73_v32, %v69_v37 }
 0x13a   :  { %2245 = vmatmul.mubr.msk.f32.vlgmr.msra.gmra.mxu0 %vm36_vm0, %v2656_v38 }
 0x1fa   :  { %v2246_v41 = vpop.f32.mrf.mxu0 }
 0x1fb   :  { %v2667_v42 = vadd.f32 %v2246_v41, %v98_v40 }
 0x1fc   :  { %v171_v43 = vpop.f32.mrf.mxu0 }
 0x1fd   :  { %v2669_v44 = vadd.f32 %v171_v43, %v98_v40  ;;  %184 = vrot.lane.b32.xlu0 %v2667_v42, %s2540_s24 }
 0x1ff   :  { %182 = vrot.lane.b32.xlu1 %v2669_v44, %s2540_s24  ;;  %2251 = vmatprep.mubr.msk.f32.mxu1 %vm186_vm1, %v2669_v44 }
 0x201   :  { %379 = vrot.lane.b32.xlu0 %v2669_v44, %s2541_s25 }
 0x203   :  { %385 = vrot.lane.b32.xlu1 %v2667_v42, %s2542_s26 }
 0x207   :  { %383 = vrot.lane.b32.xlu1 %v2669_v44, %s2542_s26 }
 0x20b   :  { %381 = vrot.lane.b32.xlu1 %v2667_v42, %s2541_s25 }
 0x26f   :  { %v185_v45 = vpop.permute.xlu0 %184 }
 0x270   :  { %2247 = vmatprep.subr.msk.mxu1 %vm186_vm1, %v185_v45 }
 0x271   :  { %2248 = vmatpush3.xpose.msk.msra.mxu1 %vm186_vm1, %v185_v45  ;;  %v183_v46 = vpop.permute.xlu1 %182 }
 0x272   :  { %2249 = vmatprep.subr.msk.mxu1 %vm186_vm1, %v183_v46 }
 0x273   :  { %v380_v48 = vpop.permute.xlu0 %379 }
 0x275   :  { %2250 = vmatpush3.xpose.msk.msra.mxu1 %vm186_vm1, %v183_v46  ;;  %v386_v47 = vpop.permute.xlu1 %385 }
 0x276   :  { %2261 = vmatprep.subr.msk.mxu1 %vm186_vm1, %v386_v47 }
 0x278   :  { %2252 = vmatmul.mubr.msk.f32.vlgmr.msra.gmra.mxu1 %vm186_vm1, %v2667_v42 }
 0x279   :  { %v384_v49 = vpop.permute.xlu1 %383  ;;  %2262 = vmatpush3.xpose.msk.msra.mxu1 %vm186_vm1, %v386_v47  ;;  %2265 = vmatprep.mubr.msk.f32.mxu1 %vm186_vm1, %v380_v48 }
 0x27a   :  { %2263 = vmatprep.subr.msk.mxu1 %vm186_vm1, %v384_v49 }
 0x27d   :  { %2264 = vmatpush3.xpose.msk.msra.mxu1 %vm186_vm1, %v384_v49  ;;  %v382_v50 = vpop.permute.xlu1 %381 }
 0x280   :  { %2266 = vmatmul.mubr.msk.f32.vlgmr.msra.gmra.mxu1 %vm186_vm1, %v382_v50 }
 0x338   :  { %v2253_v52 = vpop.f32.mrf.mxu1 }
 0x339   :  { %v267_v54 = vadd.f32 %v2253_v52, %v2700_v51 }
 0x33a   :  { %v261_v55 = vpop.f32.mrf.mxu1 }
 0x33b   :  { %v262_v56 = vadd.f32 %v261_v55, %v2705_v53  ;;  %v273_v57 = vsel %vm186_vm1, %v267_v54, -inf }
 0x33c   :  { %274 = vmax.xlane.f32.xlu1 %v273_v57  ;;  %v592_v57 = vrot.slane %v2663_v39, %v2648_v28 }
 0x33d   :  { %v270_v58 = vsel %vm186_vm1, %v262_v56, -inf }
 0x33e   :  { %271 = vmax.xlane.f32.xlu0 %v270_v58 }
 0x340   :  { %v2267_v59 = vpop.f32.mrf.mxu1 }
 0x341   :  { %v467_v62 = vadd.f32 %v2267_v59, %v2700_v51 }
 0x342   :  { %v461_v60 = vpop.f32.mrf.mxu1 }
 0x343   :  { %v462_v61 = vadd.f32 %v461_v60, %v2705_v53  ;;  %v473_v0 = vsel %vm186_vm1, %v467_v62, -inf }
 0x345   :  { %v470_v63 = vsel %vm186_vm1, %v462_v61, -inf }
 0x346   :  { %471 = vmax.xlane.f32.xlu0 %v470_v63 }
 0x34a   :  { %474 = vmax.xlane.f32.xlu0 %v473_v0 }
 0x3c5   :  { %v275_v1 = vpop.xlane.xlu1 %274 }
 0x3c6   :  { %v277_v2 = vsub.f32 %v267_v54, %v275_v1 }
 0x3c7   :  { %v272_v3 = vpop.xlane.xlu0 %271 }
 0x3c8   :  { %v280_v4 = vmul.f32 1.442695, %v277_v2  ;;  %v276_v5 = vsub.f32 %v262_v56, %v272_v3 }
 0x3ca   :  { %2433 = vpow2.f32 %v280_v4  ;;  %v278_v6 = vmul.f32 1.442695, %v276_v5 }
 0x3cc   :  { %2435 = vpow2.f32 %v278_v6 }
 0x3cf   :  { %v472_v7 = vpop.xlane.xlu0 %471 }
 0x3d0   :  { %v476_v8 = vsub.f32 %v462_v61, %v472_v7 }
 0x3d2   :  { %v478_v9 = vmul.f32 1.442695, %v476_v8 }
 0x3d3   :  { %v475_v10 = vpop.xlane.xlu0 %474 }
 0x3d4   :  { %2437 = vpow2.f32 %v478_v9  ;;  %v477_v11 = vsub.f32 %v467_v62, %v475_v10 }
 0x3d6   :  { %v480_v12 = vmul.f32 1.442695, %v477_v11  ;;  %v83_v11 = vld [vmem:[%s3047_s3 + $0x28] sm:$0xff] }
 0x3d7   :  { %v2434_v13 = vpop.eup %2433 }
 0x3d8   :  { %2439 = vpow2.f32 %v480_v12  ;;  %v285_v18 = vsel %vm186_vm1, %v2434_v13, 0.0  ;;  %v81_v12 = vld [vmem:[%s3047_s3 + $0x18] sm:$0xff] }
 0x3d9   :  { %v2436_v19 = vpop.eup %2435  ;;  %286 = vadd.xlane.f32.xlu1 %v285_v18 }
 0x3da   :  { %v282_v20 = vsel %vm186_vm1, %v2436_v19, 0.0 }
 0x3db   :  { %283 = vadd.xlane.f32.xlu0 %v282_v20 }
 0x3e1   :  { %v2438_v21 = vpop.eup %2437 }
 0x3e2   :  { %v482_v22 = vsel %vm186_vm1, %v2438_v21, 0.0 }
 0x3e3   :  { %483 = vadd.xlane.f32.xlu0 %v482_v22 }
 0x3e5   :  { %v2440_v23 = vpop.eup %2439 }
 0x3e6   :  { %v485_v24 = vsel %vm186_vm1, %v2440_v23, 0.0 }
 0x3e7   :  { %486 = vadd.xlane.f32.xlu1 %v485_v24  ;;  %v2766_v24 = vsub.s32 2, %v2639_v25 }
 0x3f8   :  { %292 = vrot.lane.b32.xlu1 %v2669_v44, %s2543_s1 }
 0x3f9   :  { %294 = vrot.lane.b32.xlu0 %v2667_v42, %s2543_s1 }
 0x3fc   :  { %494 = vrot.lane.b32.xlu1 %v2667_v42, %s2544_s10 }
 0x3fd   :  { %603 = vrot.lane.b32.xlu0 %v2614_v14, %s2545_s11 }
 0x400   :  { %492 = vrot.lane.b32.xlu1 %v2669_v44, %s2544_s10 }
 0x401   :  { %599 = vrot.lane.b32.xlu0 %v2626_v16, %s2545_s11 }
 0x404   :  { %601 = vrot.lane.b32.xlu1 %v2619_v15, %s2545_s11 }
 0x405   :  { %597 = vrot.lane.b32.xlu0 %v2635_v17, %s2545_s11 }
 0x462   :  { %v287_v27 = vpop.xlane.xlu1 %286 }
 0x463   :  { %2441 = vrcp.f32 %v287_v27  ;;  %v2769_v27 = vsub.s32 3, %v2639_v25 }
 0x464   :  { %v284_v29 = vpop.xlane.xlu0 %283 }
 0x465   :  { %2443 = vrcp.f32 %v284_v29  ;;  %v721_v29 = vrot.slane %v2663_v39, %v2766_v24 }
 0x46c   :  { %v484_v30 = vpop.xlane.xlu0 %483 }
 0x46d   :  { %2445 = vrcp.f32 %v484_v30 }
 0x470   :  { %v487_v31 = vpop.xlane.xlu1 %486  ;;  %v295_v32 = vpop.permute.xlu0 %294 }
 0x471   :  { %v2442_v33 = vpop.eup %2441  ;;  %2447 = vrcp.f32 %v487_v31  ;;  %2254 = vmatprep.subr.mxu0 %v295_v32 }
 0x472   :  { %v2444_v34 = vpop.eup %2443  ;;  %2255 = vmatpush3.msra.mxu0 %v295_v32  ;;  %v291_v40 = vmul.f32 %v2442_v33, %v2434_v13  ;;  %v79_v13 = vld [vmem:[%s3047_s3 + $0x8] sm:$0xff]  ;;  %v727_v32 = vrot.slane %v2663_v39, %v2769_v27 }
 0x473   :  { %v290_v35 = vmul.f32 %v2444_v34, %v2436_v19 }
 0x474   :  { %v293_v37 = vpop.permute.xlu1 %292  ;;  %v604_v47 = vpop.permute.xlu0 %603 }
 0x475   :  { %2256 = vmatprep.subr.mxu0 %v293_v37  ;;  %2258 = vmatprep.mubr.msk.f32.mxu0 %vm186_vm1, %v290_v35 }
 0x476   :  { %2257 = vmatpush3.msra.mxu0 %v293_v37 }
 0x477   :  { %2259 = vmatmul.mubr.msk.f32.vlgmr.msra.gmra.mxu0 %vm186_vm1, %v291_v40 }
 0x478   :  { %v495_v41 = vpop.permute.xlu1 %494  ;;  %v600_v49 = vpop.permute.xlu0 %599 }
 0x479   :  { %2268 = vmatprep.subr.mxu0 %v495_v41 }
 0x47a   :  { %v2446_v42 = vpop.eup %2445  ;;  %2269 = vmatpush3.msra.mxu0 %v495_v41 }
 0x47b   :  { %v490_v43 = vmul.f32 %v2446_v42, %v2438_v21  ;;  %v93_v42 = vld [vmem:[%s3048_s4 + $0x38] sm:$0xff] }
 0x47c   :  { %v493_v44 = vpop.permute.xlu1 %492  ;;  %v598_v50 = vpop.permute.xlu0 %597 }
 0x47d   :  { %2270 = vmatprep.subr.mxu0 %v493_v44  ;;  %2272 = vmatprep.mubr.msk.f32.mxu0 %vm186_vm1, %v490_v43  ;;  %v92_v43 = vld [vmem:[%s3048_s4 + $0x30] sm:$0xff] }
 0x47e   :  { %v2448_v45 = vpop.eup %2447  ;;  %2271 = vmatpush3.msra.mxu0 %v493_v44  ;;  %v91_v44 = vld [vmem:[%s3048_s4 + $0x28] sm:$0xff] }
 0x47f   :  { %v491_v46 = vmul.f32 %v2448_v45, %v2440_v23  ;;  %2275 = vmatprep.subr.mxu0 %v604_v47  ;;  %v90_v45 = vld [vmem:[%s3048_s4 + $0x20] sm:$0xff] }
 0x480   :  { %v602_v48 = vpop.permute.xlu1 %601 }
 0x481   :  { %2273 = vmatmul.mubr.msk.f32.vlgmr.msra.gmra.mxu0 %vm186_vm1, %v491_v46  ;;  %v89_v46 = vld [vmem:[%s3048_s4 + $0x18] sm:$0xff] }
 0x482   :  { %2276 = vmatpush3.msra.mxu0 %v604_v47  ;;  %v88_v47 = vld [vmem:[%s3048_s4 + $0x10] sm:$0xff] }
 0x483   :  { %2277 = vmatprep.subr.mxu0 %v602_v48 }
 0x484   :  { %2278 = vmatpush3.msra.mxu0 %v602_v48  ;;  %v87_v48 = vld [vmem:[%s3048_s4 + $0x8] sm:$0xff] }
 0x485   :  { %2279 = vmatprep.subr.mxu0 %v600_v49 }
 0x486   :  { %2280 = vmatpush3.msra.mxu0 %v600_v49  ;;  %v86_v49 = vld [vmem:[%s3048_s4] sm:$0xff] }
 0x487   :  { %2281 = vmatprep.subr.mxu0 %v598_v50 }
 0x488   :  { %2282 = vmatpush3.msra.mxu0 %v598_v50  ;;  %v732_v50 = vsub.s32 4, %v2639_v25 }
 0x489   :  { %2297 = vmatprep.subr.mxu0 %v93_v42 }
 0x537   :  { %v2260_v14 = vpop.f32.mrf.mxu0 }
 0x539   :  { %v370_v15 = vpop.f32.mrf.mxu0 }
 0x541   :  { %v2274_v52 = vpop.f32.mrf.mxu0 }
 0x543   :  { %v570_v54 = vpop.f32.mrf.mxu0 }
 0x544   :  { %581 = vrot.lane.b32.xlu1 %v570_v54, %s2546_s12 }
 0x548   :  { %583 = vrot.lane.b32.xlu1 %v2274_v52, %s2546_s12 }
 0x5b6   :  { %v582_v16 = vpop.permute.xlu1 %581 }
 0x5b7   :  { %v587_v17 = vsel %vm186_vm1, %v370_v15, %v582_v16 }
 0x5b8   :  { %2283 = vmatprep.mubr.msk.f32.mxu0 %vm36_vm0, %v587_v17 }
 0x5ba   :  { %v584_v55 = vpop.permute.xlu1 %583 }
 0x5bb   :  { %v588_v56 = vsel %vm186_vm1, %v2260_v14, %v584_v55  ;;  %v733_v14 = vrot.slane %v2663_v39, %v732_v50 }
 0x5bc   :  { %2284 = vmatmul.mubr.msk.f32.vlgmr.msra.gmra.mxu0 %vm36_vm0, %v588_v56 }
 0x5bd   :  { %2298 = vmatpush3.msra.mxu0 %v93_v42 }
 0x5be   :  { %2299 = vmatprep.subr.mxu0 %v92_v43 }
 0x5bf   :  { %2300 = vmatpush3.msra.mxu0 %v92_v43 }
 0x5c0   :  { %2301 = vmatprep.subr.mxu0 %v91_v44 }
 0x5c1   :  { %2302 = vmatpush3.msra.mxu0 %v91_v44 }
 0x5c2   :  { %2303 = vmatprep.subr.mxu0 %v90_v45 }
 0x5c3   :  { %2304 = vmatpush3.msra.mxu0 %v90_v45 }
 0x5c4   :  { %2305 = vmatprep.subr.mxu0 %v89_v46 }
 0x5c5   :  { %2306 = vmatpush3.msra.mxu0 %v89_v46 }
 0x5c6   :  { %2307 = vmatprep.subr.mxu0 %v88_v47 }
 0x5c7   :  { %2308 = vmatpush3.msra.mxu0 %v88_v47 }
 0x5c8   :  { %2309 = vmatprep.subr.mxu0 %v87_v48 }
 0x5c9   :  { %2310 = vmatpush3.msra.mxu0 %v87_v48  ;;  %v949_v48 = vsub.s32 6, %v2639_v25 }
 0x5ca   :  { %2311 = vmatprep.subr.mxu0 %v86_v49 }
 0x5cb   :  { %2312 = vmatpush3.msra.mxu0 %v86_v49 }
 0x67c   :  { %v2285_v58 = vpop.f32.mrf.mxu0 }
 0x67d   :  { %v687_v59 = vadd.f32 %v2285_v58, %v592_v57 }
 0x67e   :  { %v681_v60 = vpop.f32.mrf.mxu0 }
 0x67f   :  { %v682_v61 = vadd.f32 %v681_v60, %v592_v57  ;;  %v691_v62 = vadd.f32 %v687_v59, %v2656_v38 }
 0x681   :  { %v695_v63 = vsel %vm36_vm0, %v691_v62, 0.0  ;;  %v690_v0 = vadd.f32 %v682_v61, %v2652_v36  ;;  %v85_v36 = vld [vmem:[%s3047_s3 + $0x38] sm:$0xff] }
 0x682   :  { %696 = vadd.xlane.f32.xlu1 %v695_v63  ;;  %2286 = vmatprep.subr.mxu1 %v85_v36 }
 0x683   :  { %v692_v1 = vsel %vm36_vm0, %v690_v0, 0.0  ;;  %2287 = vmatpush3.msra.mxu1 %v85_v36 }
 0x684   :  { %693 = vadd.xlane.f32.xlu0 %v692_v1  ;;  %2288 = vmatprep.subr.mxu1 %v83_v11 }
 0x685   :  { %2289 = vmatpush3.msra.mxu1 %v83_v11 }
 0x686   :  { %2290 = vmatprep.subr.mxu1 %v81_v12 }
 0x687   :  { %2291 = vmatpush3.msra.mxu1 %v81_v12 }
 0x688   :  { %2292 = vmatprep.subr.mxu1 %v79_v13 }
 0x689   :  { %2293 = vmatpush3.msra.mxu1 %v79_v13 }
 0x70b   :  { %v697_v2 = vpop.xlane.xlu1 %696 }
 0x70c   :  { %v699_v3 = vmul.f32 0.03125, %v697_v2 }
 0x70d   :  { %v694_v4 = vpop.xlane.xlu0 %693 }
 0x70e   :  { %v698_v5 = vmul.f32 0.03125, %v694_v4  ;;  %v701_v6 = vsub.f32 %v691_v62, %v699_v3 }
 0x710   :  { %v700_v7 = vsub.f32 %v690_v0, %v698_v5  ;;  %v703_v10 = vmul.f32 %v701_v6, %v701_v6 }
 0x712   :  { %v702_v8 = vmul.f32 %v700_v7, %v700_v7  ;;  %v707_v38 = vsel %vm36_vm0, %v703_v10, 0.0 }
 0x714   :  { %v704_v9 = vsel %vm36_vm0, %v702_v8, 0.0  ;;  %v835_v8 = vsub.s32 5, %v2639_v25 }
 0x715   :  { %705 = vadd.xlane.f32.xlu0 %v704_v9 }
 0x716   :  { %v836_v9 = vrot.slane %v2663_v39, %v835_v8 }
 0x719   :  { %708 = vadd.xlane.f32.xlu0 %v707_v38 }
 0x79e   :  { %v706_v18 = vpop.xlane.xlu0 %705 }
 0x79f   :  { %v710_v19 = vmul.f32 0.03125, %v706_v18 }
 0x7a1   :  { %v712_v20 = vadd.f32 1e-12, %v710_v19 }
 0x7a2   :  { %v709_v21 = vpop.xlane.xlu0 %708 }
 0x7a3   :  { %2449 = vrsqrt.f32 %v712_v20  ;;  %v711_v22 = vmul.f32 0.03125, %v709_v21 }
 0x7a5   :  { %v713_v23 = vadd.f32 1e-12, %v711_v22 }
 0x7a7   :  { %2451 = vrsqrt.f32 %v713_v23 }
 0x7b0   :  { %v2450_v30 = vpop.eup %2449 }
 0x7b1   :  { %v716_v31 = vmul.f32 %v2450_v30, %v700_v7 }
 0x7b3   :  { %v722_v33 = vmul.f32 %v721_v29, %v716_v31 }
 0x7b4   :  { %v2452_v34 = vpop.eup %2451 }
 0x7b5   :  { %v717_v35 = vmul.f32 %v2452_v34, %v701_v6  ;;  %v2775_v37 = vadd.f32 %v727_v32, %v722_v33 }
 0x7b7   :  { %v723_v40 = vmul.f32 %v721_v29, %v717_v35  ;;  %2294 = vmatprep.mubr.msk.f32.mxu1 %vm36_vm0, %v2775_v37  ;;  %v2822_v35 = vld [vmem:[%s3047_s3 + $0x70] sm:$0xff] }
 0x7b8   :  { %2316 = vmatprep.subr.mxu1 %v2822_v35 }
 0x7b9   :  { %v729_v41 = vadd.f32 %v727_v32, %v723_v40  ;;  %v2834_v40 = vld [vmem:[%s3047_s3 + $0x50] sm:$0xff] }
 0x7bb   :  { %2295 = vmatmul.mubr.msk.f32.vlgmr.msra.gmra.mxu1 %vm36_vm0, %v729_v41 }
 0x7bc   :  { %2317 = vmatpush3.msra.mxu1 %v2822_v35 }
 0x87b   :  { %v2296_v15 = vpop.f32.mrf.mxu1 }
 0x87c   :  { %v812_v52 = vadd.f32 %v2296_v15, %v733_v14  ;;  %v955_v15 = vsub.s32 7, %v2639_v25 }
 0x87d   :  { %v806_v54 = vpop.f32.mrf.mxu1 }
 0x87e   :  { %v818_v16 = vmul.f32 0.044715, %v812_v52  ;;  %v807_v17 = vadd.f32 %v806_v54, %v733_v14  ;;  %v816_v5 = vmul.f32 0.5, %v812_v52  ;;  %v950_v14 = vrot.slane %v2663_v39, %v949_v48 }
 0x880   :  { %v820_v55 = vmul.f32 %v818_v16, %v812_v52  ;;  %v817_v56 = vmul.f32 0.044715, %v807_v17  ;;  %v815_v3 = vmul.f32 0.5, %v807_v17 }
 0x882   :  { %v822_v57 = vmul.f32 %v820_v55, %v812_v52  ;;  %v819_v58 = vmul.f32 %v817_v56, %v807_v17  ;;  %v956_v55 = vrot.slane %v2663_v39, %v955_v15 }
 0x884   :  { %v824_v59 = vadd.f32 %v822_v57, %v812_v52  ;;  %v821_v60 = vmul.f32 %v819_v58, %v807_v17 }
 0x886   :  { %v826_v61 = vmul.f32 0.7978846, %v824_v59  ;;  %v823_v62 = vadd.f32 %v821_v60, %v807_v17  ;;  %v2866_v59 = vld [vmem:[%s3049_s5 + $0x8] sm:$0xff] }
 0x887   :  { %v982_v60 = vrot.slane %v2866_v59, %v2642_v26 }
 0x888   :  { %2453 = vtanh.f32 %v826_v61  ;;  %v825_v63 = vmul.f32 0.7978846, %v823_v62 }
 0x88a   :  { %2455 = vtanh.f32 %v825_v63 }
 0x895   :  { %v2454_v0 = vpop.eup %2453 }
 0x896   :  { %v830_v2 = vadd.f32 1.0, %v2454_v0 }
 0x897   :  { %v2456_v1 = vpop.eup %2455 }
 0x898   :  { %v829_v4 = vadd.f32 1.0, %v2456_v1  ;;  %v832_v7 = vmul.f32 %v830_v2, %v816_v5 }
 0x89a   :  { %v831_v6 = vmul.f32 %v829_v4, %v815_v3 }
 0x89c   :  { %2313 = vmatprep.mubr.msk.f32.mxu0 %vm837_vm2, %v831_v6 }
 0x89d   :  { %2314 = vmatmul.mubr.msk.f32.vlgmr.msra.gmra.mxu0 %vm837_vm2, %v832_v7 }
 0x95d   :  { %v2315_v10 = vpop.f32.mrf.mxu0 }
 0x95e   :  { %v916_v38 = vadd.f32 %v2315_v10, %v836_v9 }
 0x95f   :  { %v910_v36 = vpop.f32.mrf.mxu0 }
 0x960   :  { %v911_v11 = vadd.f32 %v910_v36, %v836_v9  ;;  %v920_v12 = vadd.f32 %v916_v38, %v729_v41  ;;  %v2841_v41 = vld [vmem:[%s3047_s3 + $0x40] sm:$0xff] }
 0x962   :  { %v924_v13 = vsel %vm36_vm0, %v920_v12, 0.0  ;;  %v919_v18 = vadd.f32 %v911_v11, %v2775_v37  ;;  %v2827_v37 = vld [vmem:[%s3047_s3 + $0x60] sm:$0xff] }
 0x963   :  { %925 = vadd.xlane.f32.xlu1 %v924_v13  ;;  %2318 = vmatprep.subr.mxu1 %v2827_v37 }
 0x964   :  { %v921_v19 = vsel %vm36_vm0, %v919_v18, 0.0  ;;  %2319 = vmatpush3.msra.mxu1 %v2827_v37 }
 0x965   :  { %922 = vadd.xlane.f32.xlu0 %v921_v19  ;;  %2320 = vmatprep.subr.mxu1 %v2834_v40 }
 0x966   :  { %2321 = vmatpush3.msra.mxu1 %v2834_v40 }
 0x967   :  { %2322 = vmatprep.subr.mxu1 %v2841_v41 }
 0x968   :  { %2323 = vmatpush3.msra.mxu1 %v2841_v41 }
 0x9ec   :  { %v926_v20 = vpop.xlane.xlu1 %925 }
 0x9ed   :  { %v928_v21 = vmul.f32 0.03125, %v926_v20 }
 0x9ee   :  { %v923_v22 = vpop.xlane.xlu0 %922 }
 0x9ef   :  { %v930_v23 = vsub.f32 %v920_v12, %v928_v21  ;;  %v927_v29 = vmul.f32 0.03125, %v923_v22 }
 0x9f1   :  { %v929_v30 = vsub.f32 %v919_v18, %v927_v29  ;;  %v932_v31 = vmul.f32 %v930_v23, %v930_v23 }
 0x9f3   :  { %v936_v32 = vsel %vm36_vm0, %v932_v31, 0.0  ;;  %v931_v33 = vmul.f32 %v929_v30, %v929_v30 }
 0x9f4   :  { %937 = vadd.xlane.f32.xlu1 %v936_v32 }
 0x9f5   :  { %v933_v34 = vsel %vm36_vm0, %v931_v33, 0.0 }
 0x9f6   :  { %934 = vadd.xlane.f32.xlu0 %v933_v34 }
 0xa7d   :  { %v938_v42 = vpop.xlane.xlu1 %937 }
 0xa7e   :  { %v940_v43 = vmul.f32 0.03125, %v938_v42 }
 0xa7f   :  { %v935_v44 = vpop.xlane.xlu0 %934 }
 0xa80   :  { %v942_v45 = vadd.f32 1e-12, %v940_v43  ;;  %v939_v46 = vmul.f32 0.03125, %v935_v44 }
 0xa82   :  { %2457 = vrsqrt.f32 %v942_v45  ;;  %v941_v47 = vadd.f32 1e-12, %v939_v46 }
 0xa84   :  { %2459 = vrsqrt.f32 %v941_v47 }
 0xa8f   :  { %v2458_v49 = vpop.eup %2457 }
 0xa90   :  { %v946_v52 = vmul.f32 %v2458_v49, %v930_v23 }
 0xa91   :  { %v2460_v54 = vpop.eup %2459 }
 0xa92   :  { %v945_v16 = vmul.f32 %v2460_v54, %v929_v30  ;;  %v952_v17 = vmul.f32 %v950_v14, %v946_v52 }
 0xa94   :  { %v951_v56 = vmul.f32 %v950_v14, %v945_v16  ;;  %v2857_v58 = vadd.f32 %v956_v55, %v952_v17 }
 0xa96   :  { %v2855_v57 = vadd.f32 %v956_v55, %v951_v56 }
 0xa98   :  { %2324 = vmatprep.mubr.msk.f32.mxu1 %vm36_vm0, %v2855_v57 }
 0xa99   :  { %2325 = vmatmul.mubr.msk.f32.vlgmr.msra.gmra.mxu1 %vm36_vm0, %v2857_v58 }
 0xb59   :  { %v2326_v39 = vpop.f32.mrf.mxu1 }
 0xb5a   :  { %v2870_v61 = vadd.f32 %v2326_v39, %v982_v60 }
 0xb5b   :  { %v1055_v62 = vpop.f32.mrf.mxu1 }
 0xb5c   :  { %v2872_v63 = vadd.f32 %v1055_v62, %v982_v60  ;;  %1068 = vrot.lane.b32.xlu0 %v2870_v61, %s2540_s24 }
 0xb5e   :  { %1066 = vrot.lane.b32.xlu1 %v2872_v63, %s2540_s24  ;;  %2331 = vmatprep.mubr.msk.f32.mxu1 %vm186_vm1, %v2872_v63 }
 0xb60   :  { %1262 = vrot.lane.b32.xlu0 %v2872_v63, %s2541_s25 }
 0xb62   :  { %1268 = vrot.lane.b32.xlu1 %v2870_v61, %s2542_s26 }
 0xb66   :  { %1266 = vrot.lane.b32.xlu1 %v2872_v63, %s2542_s26 }
 0xb6a   :  { %1264 = vrot.lane.b32.xlu1 %v2870_v61, %s2541_s25 }
 0xbce   :  { %v1069_v26 = vpop.permute.xlu0 %1068 }
 0xbcf   :  { %2327 = vmatprep.subr.msk.mxu1 %vm186_vm1, %v1069_v26 }
 0xbd0   :  { %2328 = vmatpush3.xpose.msk.msra.mxu1 %vm186_vm1, %v1069_v26  ;;  %v1067_v0 = vpop.permute.xlu1 %1066 }
 0xbd1   :  { %2329 = vmatprep.subr.msk.mxu1 %vm186_vm1, %v1067_v0 }
 0xbd2   :  { %v1263_v2 = vpop.permute.xlu0 %1262 }
 0xbd4   :  { %2330 = vmatpush3.xpose.msk.msra.mxu1 %vm186_vm1, %v1067_v0  ;;  %v1269_v1 = vpop.permute.xlu1 %1268 }
 0xbd5   :  { %2341 = vmatprep.subr.msk.mxu1 %vm186_vm1, %v1269_v1 }
 0xbd7   :  { %2332 = vmatmul.mubr.msk.f32.vlgmr.msra.gmra.mxu1 %vm186_vm1, %v2870_v61 }
 0xbd8   :  { %v1267_v3 = vpop.permute.xlu1 %1266  ;;  %2342 = vmatpush3.xpose.msk.msra.mxu1 %vm186_vm1, %v1269_v1  ;;  %2345 = vmatprep.mubr.msk.f32.mxu1 %vm186_vm1, %v1263_v2 }
 0xbd9   :  { %2343 = vmatprep.subr.msk.mxu1 %vm186_vm1, %v1267_v3 }
 0xbdc   :  { %2344 = vmatpush3.xpose.msk.msra.mxu1 %vm186_vm1, %v1267_v3  ;;  %v1265_v4 = vpop.permute.xlu1 %1264 }
 0xbdf   :  { %2346 = vmatmul.mubr.msk.f32.vlgmr.msra.gmra.mxu1 %vm186_vm1, %v1265_v4 }
 0xc97   :  { %v2333_v5 = vpop.f32.mrf.mxu1 }
 0xc98   :  { %v1150_v6 = vadd.f32 %v2333_v5, %v2700_v51 }
 0xc99   :  { %v1144_v7 = vpop.f32.mrf.mxu1 }
 0xc9a   :  { %v1145_v9 = vadd.f32 %v1144_v7, %v2705_v53  ;;  %v1156_v10 = vsel %vm186_vm1, %v1150_v6, -inf }
 0xc9b   :  { %1157 = vmax.xlane.f32.xlu1 %v1156_v10 }
 0xc9c   :  { %v1153_v38 = vsel %vm186_vm1, %v1145_v9, -inf }
 0xc9d   :  { %1154 = vmax.xlane.f32.xlu0 %v1153_v38 }
 0xc9f   :  { %v2347_v36 = vpop.f32.mrf.mxu1 }
 0xca0   :  { %v1350_v13 = vadd.f32 %v2347_v36, %v2700_v51 }
 0xca1   :  { %v1344_v11 = vpop.f32.mrf.mxu1 }
 0xca2   :  { %v1345_v12 = vadd.f32 %v1344_v11, %v2705_v53  ;;  %v1356_v19 = vsel %vm186_vm1, %v1350_v13, -inf  ;;  %v1475_v11 = vrot.slane %v2866_v59, %v2648_v28 }
 0xca4   :  { %v1353_v18 = vsel %vm186_vm1, %v1345_v12, -inf }
 0xca5   :  { %1354 = vmax.xlane.f32.xlu0 %v1353_v18 }
 0xca9   :  { %1357 = vmax.xlane.f32.xlu0 %v1356_v19 }
 0xd24   :  { %v1158_v20 = vpop.xlane.xlu1 %1157 }
 0xd25   :  { %v1160_v21 = vsub.f32 %v1150_v6, %v1158_v20 }
 0xd26   :  { %v1155_v22 = vpop.xlane.xlu0 %1154 }
 0xd27   :  { %v1163_v23 = vmul.f32 1.442695, %v1160_v21  ;;  %v1159_v29 = vsub.f32 %v1145_v9, %v1155_v22 }
 0xd29   :  { %2461 = vpow2.f32 %v1163_v23  ;;  %v1161_v30 = vmul.f32 1.442695, %v1159_v29 }
 0xd2b   :  { %2463 = vpow2.f32 %v1161_v30 }
 0xd2e   :  { %v1355_v31 = vpop.xlane.xlu0 %1354 }
 0xd2f   :  { %v1359_v32 = vsub.f32 %v1345_v12, %v1355_v31 }
 0xd31   :  { %v1361_v33 = vmul.f32 1.442695, %v1359_v32 }
 0xd32   :  { %v1358_v53 = vpop.xlane.xlu0 %1357 }
 0xd33   :  { %2465 = vpow2.f32 %v1361_v33  ;;  %v1360_v51 = vsub.f32 %v1350_v13, %v1358_v53 }
 0xd35   :  { %v1363_v34 = vmul.f32 1.442695, %v1360_v51 }
 0xd36   :  { %v2462_v42 = vpop.eup %2461 }
 0xd37   :  { %2467 = vpow2.f32 %v1363_v34  ;;  %v1168_v43 = vsel %vm186_vm1, %v2462_v42, 0.0 }
 0xd38   :  { %v2464_v44 = vpop.eup %2463  ;;  %1169 = vadd.xlane.f32.xlu1 %v1168_v43  ;;  %v2102_v43 = vld [vmem:[%s3047_s3 + $0x58] sm:$0xff] }
 0xd39   :  { %v1165_v45 = vsel %vm186_vm1, %v2464_v44, 0.0 }
 0xd3a   :  { %1166 = vadd.xlane.f32.xlu0 %v1165_v45 }
 0xd40   :  { %v2466_v46 = vpop.eup %2465 }
 0xd41   :  { %v1365_v47 = vsel %vm186_vm1, %v2466_v46, 0.0 }
 0xd42   :  { %1366 = vadd.xlane.f32.xlu0 %v1365_v47 }
 0xd44   :  { %v2468_v49 = vpop.eup %2467 }
 0xd45   :  { %v1368_v14 = vsel %vm186_vm1, %v2468_v49, 0.0 }
 0xd46   :  { %1369 = vadd.xlane.f32.xlu1 %v1368_v14 }
 0xd57   :  { %1175 = vrot.lane.b32.xlu1 %v2872_v63, %s2543_s1 }
 0xd58   :  { %1177 = vrot.lane.b32.xlu0 %v2870_v61, %s2543_s1 }
 0xd5b   :  { %1377 = vrot.lane.b32.xlu1 %v2870_v61, %s2544_s10 }
 0xd5c   :  { %1486 = vrot.lane.b32.xlu0 %v2822_v35, %s2545_s11 }
 0xd5f   :  { %1375 = vrot.lane.b32.xlu1 %v2872_v63, %s2544_s10 }
 0xd60   :  { %1482 = vrot.lane.b32.xlu0 %v2834_v40, %s2545_s11 }
 0xd63   :  { %1484 = vrot.lane.b32.xlu1 %v2827_v37, %s2545_s11 }
 0xd64   :  { %1480 = vrot.lane.b32.xlu0 %v2841_v41, %s2545_s11 }
 0xdc1   :  { %v1170_v52 = vpop.xlane.xlu1 %1169 }
 0xdc2   :  { %2469 = vrcp.f32 %v1170_v52 }
 0xdc3   :  { %v1167_v54 = vpop.xlane.xlu0 %1166 }
 0xdc4   :  { %2471 = vrcp.f32 %v1167_v54  ;;  %v1604_v54 = vrot.slane %v2866_v59, %v2766_v24 }
 0xdcb   :  { %v1367_v16 = vpop.xlane.xlu0 %1366 }
 0xdcc   :  { %2473 = vrcp.f32 %v1367_v16 }
 0xdcf   :  { %v1370_v17 = vpop.xlane.xlu1 %1369  ;;  %v1178_v35 = vpop.permute.xlu0 %1177 }
 0xdd0   :  { %v2470_v55 = vpop.eup %2469  ;;  %2475 = vrcp.f32 %v1370_v17  ;;  %2334 = vmatprep.subr.mxu0 %v1178_v35 }
 0xdd1   :  { %v2472_v56 = vpop.eup %2471  ;;  %2335 = vmatpush3.msra.mxu0 %v1178_v35  ;;  %v1174_v37 = vmul.f32 %v2470_v55, %v2462_v42  ;;  %v2104_v42 = vld [vmem:[%s3047_s3 + $0x68] sm:$0xff]  ;;  %v1610_v35 = vrot.slane %v2866_v59, %v2769_v27 }
 0xdd2   :  { %v1173_v40 = vmul.f32 %v2472_v56, %v2464_v44  ;;  %v2100_v44 = vld [vmem:[%s3047_s3 + $0x48] sm:$0xff] }
 0xdd3   :  { %v1176_v60 = vpop.permute.xlu1 %1175  ;;  %v1487_v0 = vpop.permute.xlu0 %1486 }
 0xdd4   :  { %2336 = vmatprep.subr.mxu0 %v1176_v60  ;;  %2338 = vmatprep.mubr.msk.f32.mxu0 %vm186_vm1, %v1173_v40 }
 0xdd5   :  { %2337 = vmatpush3.msra.mxu0 %v1176_v60 }
 0xdd6   :  { %2339 = vmatmul.mubr.msk.f32.vlgmr.msra.gmra.mxu0 %vm186_vm1, %v1174_v37 }
 0xdd7   :  { %v1378_v41 = vpop.permute.xlu1 %1377  ;;  %v1483_v2 = vpop.permute.xlu0 %1482 }
 0xdd8   :  { %2348 = vmatprep.subr.mxu0 %v1378_v41 }
 0xdd9   :  { %v2474_v39 = vpop.eup %2473  ;;  %2349 = vmatpush3.msra.mxu0 %v1378_v41 }
 0xdda   :  { %v1373_v61 = vmul.f32 %v2474_v39, %v2466_v46  ;;  %v2114_v39 = vld [vmem:[%s3048_s4 + $0x78] sm:$0xff] }
 0xddb   :  { %v1376_v62 = vpop.permute.xlu1 %1375  ;;  %v1481_v3 = vpop.permute.xlu0 %1480 }
 0xddc   :  { %2350 = vmatprep.subr.mxu0 %v1376_v62  ;;  %2352 = vmatprep.mubr.msk.f32.mxu0 %vm186_vm1, %v1373_v61  ;;  %v2113_v61 = vld [vmem:[%s3048_s4 + $0x70] sm:$0xff] }
 0xddd   :  { %v2476_v63 = vpop.eup %2475  ;;  %2351 = vmatpush3.msra.mxu0 %v1376_v62  ;;  %v2112_v62 = vld [vmem:[%s3048_s4 + $0x68] sm:$0xff] }
 0xdde   :  { %v1374_v26 = vmul.f32 %v2476_v63, %v2468_v49  ;;  %2355 = vmatprep.subr.mxu0 %v1487_v0  ;;  %v2111_v63 = vld [vmem:[%s3048_s4 + $0x60] sm:$0xff] }
 0xddf   :  { %v1485_v1 = vpop.permute.xlu1 %1484 }
 0xde0   :  { %2353 = vmatmul.mubr.msk.f32.vlgmr.msra.gmra.mxu0 %vm186_vm1, %v1374_v26  ;;  %v2110_v26 = vld [vmem:[%s3048_s4 + $0x58] sm:$0xff] }
 0xde1   :  { %2356 = vmatpush3.msra.mxu0 %v1487_v0  ;;  %v2109_v0 = vld [vmem:[%s3048_s4 + $0x50] sm:$0xff] }
 0xde2   :  { %2357 = vmatprep.subr.mxu0 %v1485_v1 }
 0xde3   :  { %2358 = vmatpush3.msra.mxu0 %v1485_v1  ;;  %v2108_v1 = vld [vmem:[%s3048_s4 + $0x48] sm:$0xff] }
 0xde4   :  { %2359 = vmatprep.subr.mxu0 %v1483_v2 }
 0xde5   :  { %2360 = vmatpush3.msra.mxu0 %v1483_v2  ;;  %v2107_v2 = vld [vmem:[%s3048_s4 + $0x40] sm:$0xff] }
 0xde6   :  { %2361 = vmatprep.subr.mxu0 %v1481_v3 }
 0xde7   :  { %2362 = vmatpush3.msra.mxu0 %v1481_v3  ;;  %v1616_v3 = vrot.slane %v2866_v59, %v732_v50 }
 0xde8   :  { %2377 = vmatprep.subr.mxu0 %v2114_v39 }
 0xe96   :  { %v2340_v4 = vpop.f32.mrf.mxu0 }
 0xe98   :  { %v1253_v5 = vpop.f32.mrf.mxu0 }
 0xea0   :  { %v2354_v6 = vpop.f32.mrf.mxu0 }
 0xea2   :  { %v1453_v7 = vpop.f32.mrf.mxu0 }
 0xea3   :  { %1464 = vrot.lane.b32.xlu1 %v1453_v7, %s2546_s12 }
 0xea7   :  { %1466 = vrot.lane.b32.xlu1 %v2354_v6, %s2546_s12 }
 0xf15   :  { %v1465_v9 = vpop.permute.xlu1 %1464 }
 0xf16   :  { %v1470_v10 = vsel %vm186_vm1, %v1253_v5, %v1465_v9 }
 0xf17   :  { %2363 = vmatprep.mubr.msk.f32.mxu0 %vm36_vm0, %v1470_v10 }
 0xf19   :  { %v1467_v38 = vpop.permute.xlu1 %1466 }
 0xf1a   :  { %v1471_v36 = vsel %vm186_vm1, %v2340_v4, %v1467_v38 }
 0xf1b   :  { %2364 = vmatmul.mubr.msk.f32.vlgmr.msra.gmra.mxu0 %vm36_vm0, %v1471_v36 }
 0xf1c   :  { %2378 = vmatpush3.msra.mxu0 %v2114_v39 }
 0xf1d   :  { %2379 = vmatprep.subr.mxu0 %v2113_v61 }
 0xf1e   :  { %2380 = vmatpush3.msra.mxu0 %v2113_v61 }
 0xf1f   :  { %2381 = vmatprep.subr.mxu0 %v2112_v62 }
 0xf20   :  { %2382 = vmatpush3.msra.mxu0 %v2112_v62 }
 0xf21   :  { %2383 = vmatprep.subr.mxu0 %v2111_v63 }
 0xf22   :  { %2384 = vmatpush3.msra.mxu0 %v2111_v63  ;;  %v1832_v63 = vrot.slane %v2866_v59, %v949_v48 }
 0xf23   :  { %2385 = vmatprep.subr.mxu0 %v2110_v26 }
 0xf24   :  { %2386 = vmatpush3.msra.mxu0 %v2110_v26 }
 0xf25   :  { %2387 = vmatprep.subr.mxu0 %v2109_v0 }
 0xf26   :  { %2388 = vmatpush3.msra.mxu0 %v2109_v0 }
 0xf27   :  { %2389 = vmatprep.subr.mxu0 %v2108_v1 }
 0xf28   :  { %2390 = vmatpush3.msra.mxu0 %v2108_v1  ;;  %v1838_v1 = vrot.slane %v2866_v59, %v955_v15 }
 0xf29   :  { %2391 = vmatprep.subr.mxu0 %v2107_v2 }
 0xf2a   :  { %2392 = vmatpush3.msra.mxu0 %v2107_v2 }
 0xfdb   :  { %v2365_v12 = vpop.f32.mrf.mxu0 }
 0xfdc   :  { %v1570_v13 = vadd.f32 %v2365_v12, %v1475_v11 }
 0xfdd   :  { %v1564_v18 = vpop.f32.mrf.mxu0 }
 0xfde   :  { %v1565_v19 = vadd.f32 %v1564_v18, %v1475_v11  ;;  %v1574_v20 = vadd.f32 %v1570_v13, %v2857_v58 }
 0xfe0   :  { %v1578_v21 = vsel %vm36_vm0, %v1574_v20, 0.0  ;;  %v1573_v22 = vadd.f32 %v1565_v19, %v2855_v57  ;;  %v2106_v57 = vld [vmem:[%s3047_s3 + $0x78] sm:$0xff] }
 0xfe1   :  { %1579 = vadd.xlane.f32.xlu1 %v1578_v21  ;;  %2366 = vmatprep.subr.mxu1 %v2106_v57 }
 0xfe2   :  { %v1575_v23 = vsel %vm36_vm0, %v1573_v22, 0.0  ;;  %2367 = vmatpush3.msra.mxu1 %v2106_v57 }
 0xfe3   :  { %1576 = vadd.xlane.f32.xlu0 %v1575_v23  ;;  %2368 = vmatprep.subr.mxu1 %v2104_v42 }
 0xfe4   :  { %2369 = vmatpush3.msra.mxu1 %v2104_v42 }
 0xfe5   :  { %2370 = vmatprep.subr.mxu1 %v2102_v43 }
 0xfe6   :  { %2371 = vmatpush3.msra.mxu1 %v2102_v43 }
 0xfe7   :  { %2372 = vmatprep.subr.mxu1 %v2100_v44 }
 0xfe8   :  { %2373 = vmatpush3.msra.mxu1 %v2100_v44 }
0x106a   :  { %v1580_v29 = vpop.xlane.xlu1 %1579 }
0x106b   :  { %v1582_v30 = vmul.f32 0.03125, %v1580_v29 }
0x106c   :  { %v1577_v31 = vpop.xlane.xlu0 %1576 }
0x106d   :  { %v1581_v32 = vmul.f32 0.03125, %v1577_v31  ;;  %v1584_v33 = vsub.f32 %v1574_v20, %v1582_v30 }
0x106f   :  { %v1583_v28 = vsub.f32 %v1573_v22, %v1581_v32  ;;  %v1586_v34 = vmul.f32 %v1584_v33, %v1584_v33 }
0x1071   :  { %v1585_v53 = vmul.f32 %v1583_v28, %v1583_v28  ;;  %v1590_v58 = vsel %vm36_vm0, %v1586_v34, 0.0 }
0x1073   :  { %v1587_v51 = vsel %vm36_vm0, %v1585_v53, 0.0 }
0x1074   :  { %1588 = vadd.xlane.f32.xlu0 %v1587_v51 }
0x1078   :  { %1591 = vadd.xlane.f32.xlu0 %v1590_v58 }
0x10fd   :  { %v1589_v45 = vpop.xlane.xlu0 %1588 }
0x10fe   :  { %v1593_v46 = vmul.f32 0.03125, %v1589_v45 }
0x1100   :  { %v1595_v47 = vadd.f32 1e-12, %v1593_v46 }
0x1101   :  { %v1592_v49 = vpop.xlane.xlu0 %1591 }
0x1102   :  { %2477 = vrsqrt.f32 %v1595_v47  ;;  %v1594_v14 = vmul.f32 0.03125, %v1592_v49 }
0x1104   :  { %v1596_v52 = vadd.f32 1e-12, %v1594_v14 }
0x1106   :  { %2479 = vrsqrt.f32 %v1596_v52 }
0x110f   :  { %v2478_v16 = vpop.eup %2477 }
0x1110   :  { %v1599_v17 = vmul.f32 %v2478_v16, %v1583_v28 }
0x1112   :  { %v1605_v55 = vmul.f32 %v1604_v54, %v1599_v17  ;;  %v1844_v17 = vld [vmem:[%s3050_s6 + $0x18] sm:$0xff] }
0x1113   :  { %v2480_v56 = vpop.eup %2479 }
0x1114   :  { %v1600_v40 = vmul.f32 %v2480_v56, %v1584_v33  ;;  %v2962_v60 = vadd.f32 %v1610_v35, %v1605_v55  ;;  %v1719_v33 = vrot.slane %v2866_v59, %v835_v8  ;;  %v1843_v55 = vld [vmem:[%s3050_s6 + $0x10] sm:$0xff]  ;;  %v1842_v56 = vld [vmem:[%s3050_s6 + $0x8] sm:$0xff]  ;;  %v2495_v59 = vld [vmem:[%s3051_s7] sm:$0xf]  ;;  %s2549_s7 = smov [#allocation2]  }
0x1115   :  { %s2057_s15 = sshll.u32 %s2549_s7, 4  ;;  %s2058_s15 = int_to_ptr.vmem [resolvable:$true] %s2057_s15 }
0x1116   :  { %v1606_v37 = vmul.f32 %v1604_v54, %v1600_v40  ;;  %2374 = vmatprep.mubr.msk.f32.mxu1 %vm36_vm0, %v2962_v60  ;;  %v1841_v40 = vld [vmem:[%s3050_s6] sm:$0xff]  ;;  %s2496_s16 = scalar_lea.vmem %s2058_s15, 32  ;;  %p2501_p1 = scmp.lt.s32.totalorder %s2058_s15, %s2058_s15 }
0x1117   :  { %p2497_p0 = scmp.ne.s32.totalorder %s2058_s15, %s2496_s16  ;;  %p2502_p2 = scmp.lt.s32.totalorder %s2496_s16, %s2496_s16 }
0x1118   :  { %v1612_v41 = vadd.f32 %v1610_v35, %v1606_v37  ;;  %v2547_v35 = vmov 0.0  }
0x1119   :  { %2396 = vmatprep.subr.mxu1 %v2547_v35  ;;  %p2503_p3 = por %p2502_p2, %p2501_p1 }
0x111a   :  { %2375 = vmatmul.mubr.msk.f32.vlgmr.msra.gmra.mxu1 %vm36_vm0, %v1612_v41 }
0x111b   :  { %2404 = vmatprep.mubr.msk.f32.mxu1 %vm2548_vm3, %v2547_v35  ;;  %2397 = vmatpush3.msra.mxu1 %v1844_v17  ;;  %p2504_p4 = pnand %p2503_p3, %p2497_p0 }
0x111c   :  { %2398 = vmatprep.subr.mxu1 %v2547_v35 }
0x111d   :  { %2399 = vmatpush3.msra.mxu1 %v1843_v55 }
0x111e   :  { %2400 = vmatprep.subr.mxu1 %v2547_v35 }
0x111f   :  { %2401 = vmatpush3.msra.mxu1 %v1842_v56 }
0x1120   :  { %2402 = vmatprep.subr.mxu1 %v2547_v35 }
0x1121   :  { %2403 = vmatpush3.msra.mxu1 %v1841_v40 }
0x1122   :  { %2407 = vmatprep.subr.mxu1 %v2547_v35 }
0x11da   :  { %v2376_v4 = vpop.f32.mrf.mxu1 }
0x11db   :  { %v1695_v5 = vadd.f32 %v2376_v4, %v1616_v3 }
0x11dc   :  { %v1689_v6 = vpop.f32.mrf.mxu1 }
0x11dd   :  { %v1701_v7 = vmul.f32 0.044715, %v1695_v5  ;;  %v1690_v9 = vadd.f32 %v1689_v6, %v1616_v3  ;;  %v1699_v30 = vmul.f32 0.5, %v1695_v5 }
0x11df   :  { %v1703_v10 = vmul.f32 %v1701_v7, %v1695_v5  ;;  %v1700_v38 = vmul.f32 0.044715, %v1690_v9  ;;  %v1698_v50 = vmul.f32 0.5, %v1690_v9 }
0x11e1   :  { %v1705_v36 = vmul.f32 %v1703_v10, %v1695_v5  ;;  %v1702_v11 = vmul.f32 %v1700_v38, %v1690_v9 }
0x11e3   :  { %v1707_v12 = vadd.f32 %v1705_v36, %v1695_v5  ;;  %v1704_v13 = vmul.f32 %v1702_v11, %v1690_v9  ;;  %v1848_v36 = vrot.slane %v2495_v59, %v2766_v24 }
0x11e5   :  { %v1709_v18 = vmul.f32 0.7978846, %v1707_v12  ;;  %v1706_v19 = vadd.f32 %v1704_v13, %v1690_v9 }
0x11e7   :  { %2481 = vtanh.f32 %v1709_v18  ;;  %v1708_v20 = vmul.f32 0.7978846, %v1706_v19  ;;  %v1930_v19 = vrot.slane %v2495_v59, %v2769_v27 }
0x11e9   :  { %2483 = vtanh.f32 %v1708_v20 }
0x11f4   :  { %v2482_v21 = vpop.eup %2481 }
0x11f5   :  { %v1713_v23 = vadd.f32 1.0, %v2482_v21  ;;  %v2034_v21 = vld [vmem:[%s3046_s2] sm:$0x3] }
0x11f6   :  { %v2484_v22 = vpop.eup %2483 }
0x11f7   :  { %v1712_v29 = vadd.f32 1.0, %v2484_v22  ;;  %v1715_v32 = vmul.f32 %v1713_v23, %v1699_v30 }
0x11f9   :  { %v1714_v31 = vmul.f32 %v1712_v29, %v1698_v50 }
0x11fb   :  { %2393 = vmatprep.mubr.msk.f32.mxu0 %vm837_vm2, %v1714_v31 }
0x11fc   :  { %2394 = vmatmul.mubr.msk.f32.vlgmr.msra.gmra.mxu0 %vm837_vm2, %v1715_v32 }
0x12bc   :  { %v2395_v28 = vpop.f32.mrf.mxu0 }
0x12bd   :  { %v1798_v53 = vadd.f32 %v2395_v28, %v1719_v33 }
0x12be   :  { %v1792_v51 = vpop.f32.mrf.mxu0 }
0x12bf   :  { %v1793_v34 = vadd.f32 %v1792_v51, %v1719_v33  ;;  %v1802_v58 = vadd.f32 %v1798_v53, %v1612_v41 }
0x12c1   :  { %v1806_v57 = vsel %vm36_vm0, %v1802_v58, 0.0  ;;  %v1801_v42 = vadd.f32 %v1793_v34, %v2962_v60 }
0x12c2   :  { %1807 = vadd.xlane.f32.xlu0 %v1806_v57 }
0x12c3   :  { %v1803_v43 = vsel %vm36_vm0, %v1801_v42, 0.0 }
0x12c4   :  { %1804 = vadd.xlane.f32.xlu1 %v1803_v43 }
0x134b   :  { %v1808_v44 = vpop.xlane.xlu0 %1807 }
0x134c   :  { %v1810_v45 = vmul.f32 0.03125, %v1808_v44 }
0x134d   :  { %v1805_v46 = vpop.xlane.xlu1 %1804 }
0x134e   :  { %v1812_v47 = vsub.f32 %v1802_v58, %v1810_v45  ;;  %v1809_v49 = vmul.f32 0.03125, %v1805_v46 }
0x1350   :  { %v1811_v14 = vsub.f32 %v1801_v42, %v1809_v49  ;;  %v1814_v8 = vmul.f32 %v1812_v47, %v1812_v47 }
0x1352   :  { %v1818_v52 = vsel %vm36_vm0, %v1814_v8, 0.0  ;;  %v1813_v54 = vmul.f32 %v1811_v14, %v1811_v14 }
0x1353   :  { %1819 = vadd.xlane.f32.xlu0 %v1818_v52 }
0x1354   :  { %v1815_v16 = vsel %vm36_vm0, %v1813_v54, 0.0 }
0x1355   :  { %1816 = vadd.xlane.f32.xlu1 %v1815_v16 }
0x1366   :  { %1939 = vrot.lane.b32.xlu1 %v1843_v55, %s2540_s24 }
0x1369   :  { %1941 = vrot.lane.b32.xlu0 %v1844_v17, %s2540_s24 }
0x136a   :  { %1937 = vrot.lane.b32.xlu1 %v1842_v56, %s2540_s24 }
0x136e   :  { %1935 = vrot.lane.b32.xlu1 %v1841_v40, %s2540_s24 }
0x13dc   :  { %v1820_v60 = vpop.xlane.xlu0 %1819 }
0x13dd   :  { %v1822_v37 = vmul.f32 0.03125, %v1820_v60 }
0x13de   :  { %v1817_v41 = vpop.xlane.xlu1 %1816 }
0x13df   :  { %v1824_v39 = vadd.f32 1e-12, %v1822_v37  ;;  %v1821_v61 = vmul.f32 0.03125, %v1817_v41 }
0x13e0   :  { %v1942_v48 = vpop.permute.xlu0 %1941 }
0x13e1   :  { %2485 = vrsqrt.f32 %v1824_v39  ;;  %v1823_v62 = vadd.f32 1e-12, %v1821_v61 }
0x13e2   :  { %v1940_v38 = vpop.permute.xlu1 %1939 }
0x13e3   :  { %2487 = vrsqrt.f32 %v1823_v62 }
0x13e6   :  { %v1938_v25 = vpop.permute.xlu1 %1937 }
0x13ea   :  { %v1936_v15 = vpop.permute.xlu1 %1935 }
0x13ee   :  { %v2486_v26 = vpop.eup %2485 }
0x13ef   :  { %v1828_v0 = vmul.f32 %v2486_v26, %v1812_v47 }
0x13f0   :  { %v2488_v2 = vpop.eup %2487 }
0x13f1   :  { %v1827_v3 = vmul.f32 %v2488_v2, %v1811_v14  ;;  %v1834_v4 = vmul.f32 %v1832_v63, %v1828_v0 }
0x13f3   :  { %v1833_v5 = vmul.f32 %v1832_v63, %v1827_v3  ;;  %v1840_v6 = vadd.f32 %v1838_v1, %v1834_v4 }
0x13f5   :  { %v1839_v7 = vadd.f32 %v1838_v1, %v1833_v5  ;;  %v1851_v9 = vrot.slane %v1840_v6, 7 }
0x13f7   :  { %v1853_v10 = vsel %vm1852_vm4, %v1851_v9, %v1839_v7 }
0x13f8   :  { %2405 = vmatmul.mubr.msk.f32.vlgmr.msra.gmra.mxu1 %vm36_vm0, %v1853_v10 }
0x13f9   :  { %2415 = vmatprep.mubr.msk.f32.mxu1 %vm2548_vm3, %v2547_v35  ;;  %2408 = vmatpush3.msra.mxu1 %v1942_v48 }
0x13fa   :  { %2409 = vmatprep.subr.mxu1 %v2547_v35 }
0x13fb   :  { %2410 = vmatpush3.msra.mxu1 %v1940_v38 }
0x13fc   :  { %2411 = vmatprep.subr.mxu1 %v2547_v35 }
0x13fd   :  { %2412 = vmatpush3.msra.mxu1 %v1938_v25 }
0x13fe   :  { %2413 = vmatprep.subr.mxu1 %v2547_v35 }
0x13ff   :  { %2414 = vmatpush3.msra.mxu1 %v1936_v15 }
0x14b8   :  { %v1922_v11 = vpop.f32.mrf.mxu1 }
0x14b9   :  { %v1923_v12 = vadd.f32 %v1922_v11, %v1848_v36 }
0x14ba   :  { %v2406_v13 = vpop.f32.mrf.mxu1 }
0x14bb   :  { %2489 = vtanh.f32 %v1923_v12 }
0x14c8   :  { %v2490_v18 = vpop.eup %2489 }
0x14c9   :  { %2416 = vmatmul.mubr.msk.f32.vlgmr.msra.gmra.mxu1 %vm36_vm0, %v2490_v18 }
0x1589   :  { %v2016_v20 = vpop.f32.mrf.mxu1 }
0x158a   :  { %v2017_v22 = vadd.f32 %v2016_v20, %v1930_v19 }
0x158b   :  { %v2417_v23 = vpop.f32.mrf.mxu1 }
0x158c   :  { %v2022_v50 = vsel %vm2020_vm5, %v2017_v22, -inf  ;;  %2021 = vst.msk [vmem:[#allocation2] sm:$0x3] %vm2020_vm5, %v2017_v22  ;;  %v2035_v24 = vmul.f32 %v2034_v21, %v2017_v22 }
0x158d   :  { %2023 = vmax.xlane.f32.xlu0 %v2022_v50 }
0x158e   :  { %v2036_v29 = vsel %vm2020_vm5, %v2035_v24, 0.0 }
0x1591   :  { %2037 = vadd.xlane.f32.xlu0 %v2036_v29 }
0x1616   :  { %v2024_v30 = vpop.xlane.xlu0 %2023 }
0x1617   :  { %v2025_v31 = vsub.f32 %v2017_v22, %v2024_v30 }
0x1619   :  { %v2026_v32 = vmul.f32 1.442695, %v2025_v31 }
0x161b   :  { %2491 = vpow2.f32 %v2026_v32 }
0x1628   :  { %v2492_v33 = vpop.eup %2491 }
0x1629   :  { %v2028_v27 = vsel %vm2020_vm5, %v2492_v33, 0.0 }
0x162a   :  { %2029 = vadd.xlane.f32.xlu1 %v2028_v27 }
0x162b   :  { %2507 = shalt.err (!%p2504_p4)
}
0x162c   :  { %2060 = dma.vmem_to_hbm [thread:$0]  %s2058_s15, 32, %s3052_s8, [#allocation3]   ;;  %v2038_v58 = vpop.xlane.xlu0 %2037  ;;  %vm2040_vm6 = vcmask 1041408   ;;  %vm2049_vm7 = vcmask 0  }
0x162d   :  { %s2550_s18 = smov [#allocation4]  }
0x162e   :  { %s2067_s19 = sshll.u32 %s2550_s18, 4  ;;  %s2068_s19 = int_to_ptr.vmem [resolvable:$true] %s2067_s19 }
0x162f   :  { %s2516_s8 = scalar_lea.vmem %s2068_s19, 16  ;;  %s2520_s20 = scalar_lea.vmem %s2068_s19, 32 }
0x1630   :  { %p2517_p5 = scmp.ne.s32.totalorder %s2068_s19, %s2516_s8  ;;  %p2521_p6 = scmp.lt.s32.totalorder %s2068_s19, %s2068_s19 }
0x1631   :  { %p2522_p7 = scmp.lt.s32.totalorder %s2520_s20, %s2516_s8 }
0x1633   :  { %p2523_p8 = por %p2522_p7, %p2521_p6 }
0x1635   :  { %p2524_p9 = pnand %p2523_p8, %p2517_p5 }
0x16b3   :  { %v2030_v28 = vpop.xlane.xlu1 %2029 }
0x16b4   :  { %2493 = vlog2.f32 %v2030_v28 }
0x16c1   :  { %v2494_v53 = vpop.eup %2493 }
0x16c2   :  { %v2032_v51 = vmul.f32 0.6931472, %v2494_v53 }
0x16c4   :  { %v2033_v34 = vadd.f32 %v2032_v51, %v2024_v30 }
0x16c6   :  { %v2039_v57 = vsub.f32 %v2033_v34, %v2038_v58 }
0x16c8   :  { %v2041_v42 = vsel %vm2040_vm6, %v2039_v57, 0.0 }
0x16c9   :  { %v2042_v43 = vrot.slane %v2041_v42, 4 }
0x16cb   :  { %v2043_v44 = vadd.f32 %v2042_v43, %v2041_v42 }
0x16cd   :  { %v2044_v45 = vrot.slane %v2043_v44, 2 }
0x16cf   :  { %v2045_v46 = vadd.f32 %v2044_v45, %v2043_v44 }
0x16d1   :  { %v2046_v47 = vrot.slane %v2045_v46, 1 }
0x16d3   :  { %v2047_v49 = vadd.f32 %v2046_v47, %v2045_v46 }
0x16d5   :  { %v2048_v14 = vmul.f32 0.5, %v2047_v49 }
0x16d7   :  { %2050 = vst.msk [vmem:[#allocation4] sm:$0x1] %vm2049_vm7, %v2048_v14 }
0x16d8   :  { %2527 = shalt.err (!%p2524_p9)
}
0x16d9   :  { %2070 = dma.vmem_to_hbm [thread:$0]  %s2068_s19, 16, %s3053_s9, [#allocation5]  }
0x16da   :  { %2536 = dma.done.wait [#allocation3], 32  }
0x16db   :  { %2537 = vsyncadd [#allocation3], 4294967264 }
0x16dc   :  { %2538 = dma.done.wait [#allocation5], 16  }
0x16dd   :  { %2539 = vsyncadd [#allocation5], 4294967280 }
0x16de   :  { %2077 = vsyncpa [#allocation3], 1 }
0x16df   :  { %2078 = vsyncpa [#allocation5], 1 }

</bundles_post_ra>
